<compile_context>
chip_gen: v5e
topology: v5e:2x2
jax: 0.10.0
libtpu: 0.0.40
codegen_flags: <defaults>
</compile_context>

<pallas_src>
import functools

import jax
import jax.numpy as jnp
import numpy as np
from jax import lax
from jax.experimental import pallas as pl
from jax.experimental.pallas import tpu as pltpu


def _round_up(a, b):
    return (a + b - 1) // b * b


_DOT_RED = (((0,), (0,)), ((), ()))   # contract row dims: (n,B)x(n,D)->(B,D)
_DOT_GAT = (((1,), (0,)), ((), ()))   # gather:            (n,B)x(B,D)->(n,D)
_HI = lax.Precision.HIGHEST


# ---------------------------------------------------------------------------
# Pass 1: per-segment statistics -> scale/beta tables of shape (B_pad, D)
# ---------------------------------------------------------------------------
def _stats_kernel(x_ref, seg_ref, inv_cnt_ref, cnt_ref, w_ref, ms_ref, b_ref,
                  scale_ref, beta_ref, s1_acc, s2_acc, *, total_rows):
    i = pl.program_id(0)
    tile_n = x_ref.shape[0]
    b_pad = s1_acc.shape[0]

    @pl.when(i == 0)
    def _init():
        s1_acc[...] = jnp.zeros_like(s1_acc)
        s2_acc[...] = jnp.zeros_like(s2_acc)

    # Mask rows of the partial last tile (stale VMEM could be inf/nan; zeroing
    # x makes the one-hot contraction contribute exactly zero for them).
    row = i * tile_n + lax.broadcasted_iota(jnp.int32, (tile_n, 1), 0)
    valid = row < total_rows
    x = jnp.where(valid, x_ref[...].astype(jnp.float32), 0.0)   # (tile_n, D)
    seg = seg_ref[...]                                          # (tile_n, 1)

    col = lax.broadcasted_iota(jnp.int32, (tile_n, b_pad), 1)
    onehot = jnp.where(col == seg, 1.0, 0.0)                    # (tile_n, B_pad)

    # Segment sums on the MXU (VPU stays free; HBM remains the bottleneck).
    s1_acc[...] += lax.dot_general(onehot, x, _DOT_RED,
                                   preferred_element_type=jnp.float32,
                                   precision=_HI)
    s2_acc[...] += lax.dot_general(onehot, x * x, _DOT_RED,
                                   preferred_element_type=jnp.float32,
                                   precision=_HI)

    @pl.when(i == pl.num_programs(0) - 1)
    def _finalize():
        inv_cnt = inv_cnt_ref[...]          # (B_pad, 1)  1/(count + 1e-6)
        cnt = cnt_ref[...]                  # (B_pad, 1)  true row count
        s1 = s1_acc[...]                    # sum(x)
        s2 = s2_acc[...]                    # sum(x^2)
        mean = s1 * inv_cnt
        mu = ms_ref[...] * mean             # what gets subtracted per row
        # sum((x - mu)^2) = sum(x^2) - 2*mu*sum(x) + n*mu^2
        seg_sq = s2 - 2.0 * mu * s1 + cnt * mu * mu
        inv_std = lax.rsqrt(seg_sq * inv_cnt + 1e-6)
        scale = w_ref[...] * inv_std        # weight folded into the scale
        scale_ref[...] = scale
        beta_ref[...] = b_ref[...] - mu * scale   # bias folded in


# ---------------------------------------------------------------------------
# Pass 2: out = x * scale[seg] + beta[seg]   (gather via one-hot matmul)
# ---------------------------------------------------------------------------
def _apply_kernel(x_ref, seg_ref, scale_tab_ref, beta_tab_ref, out_ref):
    x = x_ref[...].astype(jnp.float32)          # (tile_n, D)
    seg = seg_ref[...]                          # (tile_n, 1)
    tile_n = x.shape[0]
    b_pad = scale_tab_ref.shape[0]

    col = lax.broadcasted_iota(jnp.int32, (tile_n, b_pad), 1)
    onehot = jnp.where(col == seg, 1.0, 0.0)

    scale = lax.dot_general(onehot, scale_tab_ref[...], _DOT_GAT,
                            preferred_element_type=jnp.float32, precision=_HI)
    beta = lax.dot_general(onehot, beta_tab_ref[...], _DOT_GAT,
                           preferred_element_type=jnp.float32, precision=_HI)
    # Partial last tile: garbage rows are never written back (OOB drop).
    out_ref[...] = (x * scale + beta).astype(out_ref.dtype)


# ---------------------------------------------------------------------------
# Fused single-kernel fast path (whole problem resident in VMEM):
# x is read from HBM exactly once, out written once.
# ---------------------------------------------------------------------------
def _fused_kernel(x_ref, seg_ref, inv_cnt_ref, cnt_ref, w_ref, ms_ref, b_ref,
                  out_ref):
    x = x_ref[...].astype(jnp.float32)          # (N, D) resident
    seg = seg_ref[...]                          # (N, 1)
    n = x.shape[0]
    b_pad = inv_cnt_ref.shape[0]

    col = lax.broadcasted_iota(jnp.int32, (n, b_pad), 1)
    onehot = jnp.where(col == seg, 1.0, 0.0)

    s1 = lax.dot_general(onehot, x, _DOT_RED,
                         preferred_element_type=jnp.float32, precision=_HI)
    s2 = lax.dot_general(onehot, x * x, _DOT_RED,
                         preferred_element_type=jnp.float32, precision=_HI)

    inv_cnt = inv_cnt_ref[...]
    cnt = cnt_ref[...]
    mean = s1 * inv_cnt
    mu = ms_ref[...] * mean
    seg_sq = s2 - 2.0 * mu * s1 + cnt * mu * mu
    inv_std = lax.rsqrt(seg_sq * inv_cnt + 1e-6)
    scale_tab = w_ref[...] * inv_std
    beta_tab = b_ref[...] - mu * scale_tab

    scale = lax.dot_general(onehot, scale_tab, _DOT_GAT,
                            preferred_element_type=jnp.float32, precision=_HI)
    beta = lax.dot_general(onehot, beta_tab, _DOT_GAT,
                           preferred_element_type=jnp.float32, precision=_HI)
    out_ref[...] = (x * scale + beta).astype(out_ref.dtype)


# ---------------------------------------------------------------------------
# Wrapper (jit-compatible: all index/count prep uses jnp ops, shapes static)
# ---------------------------------------------------------------------------
def graph_norm(x, nodes_per_img, weight, bias, mean_scale, *,
               block_n=None, force_two_pass=False):
    """Pallas implementation of Norm('graph').forward(x, nodes_per_img)."""
    N, D = x.shape
    counts_i = jnp.asarray(nodes_per_img, dtype=jnp.int32).reshape(-1)
    B = int(counts_i.shape[0])
    B_pad = _round_up(max(B, 1), 8)
    counts_f = counts_i.astype(jnp.float32)

    # Contiguous per-node segment ids; jittable (total_repeat_length static).
    seg = jnp.repeat(jnp.arange(B, dtype=jnp.int32), counts_i,
                     total_repeat_length=N).reshape(N, 1)

    cnt_f = jnp.zeros((B_pad, 1), jnp.float32).at[:B, 0].set(counts_f)
    inv_cnt = jnp.zeros((B_pad, 1), jnp.float32).at[:B, 0].set(
        1.0 / (counts_f + jnp.float32(1e-6)))

    w = weight.reshape(1, D).astype(jnp.float32)
    b = bias.reshape(1, D).astype(jnp.float32)
    ms = mean_scale.reshape(1, D).astype(jnp.float32)

    # ---- fused fast path: whole problem fits comfortably in VMEM ----
    n8 = _round_up(N, 8)
    d128 = _round_up(D, 128)
    fused_bytes = 6 * n8 * d128 * 4 + n8 * _round_up(B_pad, 128) * 4
    if not force_two_pass and fused_bytes <= 12 * 1024 * 1024:
        full = lambda i: (0, 0)
        return pl.pallas_call(
            _fused_kernel,
            out_shape=jax.ShapeDtypeStruct((N, D), x.dtype),
            grid=(1,),
            in_specs=[pl.BlockSpec((N, D), full),
                      pl.BlockSpec((N, 1), full),
                      pl.BlockSpec((B_pad, 1), full),
                      pl.BlockSpec((B_pad, 1), full),
                      pl.BlockSpec((1, D), full),
                      pl.BlockSpec((1, D), full),
                      pl.BlockSpec((1, D), full)],
            out_specs=pl.BlockSpec((N, D), full),
        )(x, seg, inv_cnt, cnt_f, w, ms, b)

    # ---- streamed two-pass path ----
    # ~2 MiB x-tiles: big enough to amortize per-step overhead, small enough
    # that pass-2's live set (2 dbuf x-tiles + 2 dbuf out-tiles + tables) fits
    # every generation's default scoped VMEM limit (incl. v5e's 16 MiB).
    if block_n is None:
        tile_n = (2 * 1024 * 1024) // max(D * 4, 1)
        tile_n = max(64, min(8192, tile_n))
    else:
        tile_n = block_n
    tile_n = _round_up(tile_n, 8)
    tile_n = min(tile_n, _round_up(N, 8))
    n_tiles = -(-N // tile_n)

    row_spec = pl.BlockSpec((tile_n, D), lambda i: (i, 0))
    seg_spec = pl.BlockSpec((tile_n, 1), lambda i: (i, 0))
    tab_spec = pl.BlockSpec((B_pad, D), lambda i: (0, 0))
    col_spec = pl.BlockSpec((B_pad, 1), lambda i: (0, 0))
    par_spec = pl.BlockSpec((1, D), lambda i: (0, 0))

    # Pass 1: per-segment stats (reduction over the N axis, resident output).
    scale_tab, beta_tab = pl.pallas_call(
        functools.partial(_stats_kernel, total_rows=N),
        out_shape=(jax.ShapeDtypeStruct((B_pad, D), jnp.float32),
                   jax.ShapeDtypeStruct((B_pad, D), jnp.float32)),
        grid=(n_tiles,),
        in_specs=[row_spec, seg_spec, col_spec, col_spec,
                  par_spec, par_spec, par_spec],
        out_specs=(tab_spec, tab_spec),
        scratch_shapes=[pltpu.VMEM((B_pad, D), jnp.float32),
                        pltpu.VMEM((B_pad, D), jnp.float32)],
        compiler_params=pltpu.CompilerParams(
            dimension_semantics=("arbitrary",)),
    )(x, seg, inv_cnt, cnt_f, w, ms, b)

    # Pass 2: normalize (independent tiles -> megacore parallel on v7x).
    out = pl.pallas_call(
        _apply_kernel,
        out_shape=jax.ShapeDtypeStruct((N, D), x.dtype),
        grid=(n_tiles,),
        in_specs=[row_spec, seg_spec, tab_spec, tab_spec],
        out_specs=row_spec,
        compiler_params=pltpu.CompilerParams(
            dimension_semantics=("parallel",)),
    )(x, seg, scale_tab, beta_tab)
    return out


# ---------------------------------------------------------------------------
# Pure-JAX reference mirroring the PyTorch code path exactly.
# ---------------------------------------------------------------------------
def graph_norm_ref(x, nodes_per_img, weight, bias, mean_scale):
    counts = np.asarray(nodes_per_img, dtype=np.int64)
    offs = np.concatenate([[0], np.cumsum(counts)])
    outs = []
    for k in range(len(counts)):
        xb = x[int(offs[k]):int(offs[k + 1])]
        cnt = jnp.float32(counts[k])
        mean = jnp.sum(xb, axis=0) / (cnt + 1e-6)
        sub = xb - mean * mean_scale
        std = jnp.sqrt(jnp.sum(sub * sub, axis=0) / (cnt + 1e-6) + 1e-6)
        outs.append(weight * sub / std + bias)
    return jnp.concatenate(outs, axis=0)


if __name__ == "__main__":
    hidden_dim = 32
    nodes_per_img = [37, 91, 28]          # 3 graphs, 156 nodes total
    N = int(sum(nodes_per_img))

    key = jax.random.PRNGKey(0)
    kx, kw, kb, km = jax.random.split(key, 4)
    x = jax.random.normal(kx, (N, hidden_dim), dtype=jnp.float32)

    # Norm.__init__('graph') uses ones/zeros/ones; perturb deterministically so
    # the weight/bias/mean_scale paths are actually exercised by the check.
    weight = 1.0 + 0.1 * jax.random.normal(kw, (hidden_dim,), dtype=jnp.float32)
    bias = 0.1 * jax.random.normal(kb, (hidden_dim,), dtype=jnp.float32)
    mean_scale = 1.0 + 0.1 * jax.random.normal(km, (hidden_dim,), dtype=jnp.float32)

    ref = graph_norm_ref(x, nodes_per_img, weight, bias, mean_scale)

    # Fused single-kernel fast path (this problem fits in VMEM).
    out_fused = graph_norm(x, nodes_per_img, weight, bias, mean_scale)
    out_fused = jax.block_until_ready(out_fused)
    np.testing.assert_allclose(np.asarray(out_fused), np.asarray(ref),
                               rtol=1e-4, atol=1e-5)

    # Streamed two-pass path, forced with a small tile so multiple tiles and
    # the partial last tile (28 of 64 rows) are exercised.
    out_2p = graph_norm(x, nodes_per_img, weight, bias, mean_scale,
                        block_n=64, force_two_pass=True)
    out_2p = jax.block_until_ready(out_2p)
    np.testing.assert_allclose(np.asarray(out_2p), np.asarray(ref),
                               rtol=1e-4, atol=1e-5)

    print("KERNEL_OK")
</pallas_src>

<mosaic_0001>
module attributes {stable_mosaic.version = 11 : i64} {
  func.func @_fused_kernel(%arg0: i32, %arg1: memref<156x32xf32, #tpu.memory_space<vmem>>, %arg2: memref<156x1xi32, #tpu.memory_space<vmem>>, %arg3: memref<8x1xf32, #tpu.memory_space<vmem>>, %arg4: memref<8x1xf32, #tpu.memory_space<vmem>>, %arg5: memref<1x32xf32, #tpu.memory_space<vmem>>, %arg6: memref<1x32xf32, #tpu.memory_space<vmem>>, %arg7: memref<1x32xf32, #tpu.memory_space<vmem>>, %arg8: memref<156x32xf32, #tpu.memory_space<vmem>>) attributes {dimension_semantics = [#tpu.dimension_semantics<arbitrary>], iteration_bounds = array<i64: 1>, scalar_prefetch = 0 : i64, scratch_operands = 0 : i64, tpu.core_type = #tpu.core_type<tc>, window_params = [{pipeline_mode = #tpu.pipeline_mode<synchronous>, transform_indices = @transform_0, window_bounds = array<i64: 156, 32>}, {pipeline_mode = #tpu.pipeline_mode<synchronous>, transform_indices = @transform_1, window_bounds = array<i64: 156, 1>}, {pipeline_mode = #tpu.pipeline_mode<synchronous>, transform_indices = @transform_2, window_bounds = array<i64: 8, 1>}, {pipeline_mode = #tpu.pipeline_mode<synchronous>, transform_indices = @transform_3, window_bounds = array<i64: 8, 1>}, {pipeline_mode = #tpu.pipeline_mode<synchronous>, transform_indices = @transform_4, window_bounds = array<i64: 1, 32>}, {pipeline_mode = #tpu.pipeline_mode<synchronous>, transform_indices = @transform_5, window_bounds = array<i64: 1, 32>}, {pipeline_mode = #tpu.pipeline_mode<synchronous>, transform_indices = @transform_6, window_bounds = array<i64: 1, 32>}, {pipeline_mode = #tpu.pipeline_mode<synchronous>, transform_indices = @transform_7, window_bounds = array<i64: 156, 32>}]} {
    %c0 = arith.constant 0 : index
    %c0_0 = arith.constant 0 : index
    %0 = vector.load %arg1[%c0, %c0_0] : memref<156x32xf32, #tpu.memory_space<vmem>>, vector<156x32xf32>
    %c0_1 = arith.constant 0 : index
    %c0_2 = arith.constant 0 : index
    %1 = vector.load %arg2[%c0_1, %c0_2] : memref<156x1xi32, #tpu.memory_space<vmem>>, vector<156x1xi32>
    %2 = tpu.iota {dimensions = array<i32: 1>} : vector<156x8xi32>
    %3 = vector.broadcast %1 : vector<156x1xi32> to vector<156x8xi32>
    %4 = arith.cmpi eq, %2, %3 : vector<156x8xi32>
    %cst = arith.constant 1.000000e+00 : f32
    %cst_3 = arith.constant 0.000000e+00 : f32
    %5 = vector.broadcast %cst : f32 to vector<156x8xf32>
    %6 = vector.broadcast %cst_3 : f32 to vector<156x8xf32>
    %7 = arith.select %4, %5, %6 : vector<156x8xi1>, vector<156x8xf32>
    %cst_4 = arith.constant dense<0.000000e+00> : vector<8x32xf32>
    %8 = tpu.matmul %7, %0, %cst_4 {dimension_numbers = #tpu.dot_dimension_numbers<[0], [0], [1], [1], [0, 1, 1, 1], [], []>, precision = #tpu.contract_precision<fp32>} : vector<156x8xf32>, vector<156x32xf32>, vector<8x32xf32> -> vector<8x32xf32>
    %9 = arith.mulf %0, %0 : vector<156x32xf32>
    %cst_5 = arith.constant dense<0.000000e+00> : vector<8x32xf32>
    %10 = tpu.matmul %7, %9, %cst_5 {dimension_numbers = #tpu.dot_dimension_numbers<[0], [0], [1], [1], [0, 1, 1, 1], [], []>, precision = #tpu.contract_precision<fp32>} : vector<156x8xf32>, vector<156x32xf32>, vector<8x32xf32> -> vector<8x32xf32>
    %c0_6 = arith.constant 0 : index
    %c0_7 = arith.constant 0 : index
    %11 = vector.load %arg3[%c0_6, %c0_7] : memref<8x1xf32, #tpu.memory_space<vmem>>, vector<8x1xf32>
    %c0_8 = arith.constant 0 : index
    %c0_9 = arith.constant 0 : index
    %12 = vector.load %arg4[%c0_8, %c0_9] : memref<8x1xf32, #tpu.memory_space<vmem>>, vector<8x1xf32>
    %13 = vector.broadcast %11 : vector<8x1xf32> to vector<8x32xf32>
    %14 = arith.mulf %8, %13 : vector<8x32xf32>
    %c0_10 = arith.constant 0 : index
    %c0_11 = arith.constant 0 : index
    %15 = vector.load %arg6[%c0_10, %c0_11] : memref<1x32xf32, #tpu.memory_space<vmem>>, vector<1x32xf32>
    %16 = vector.broadcast %15 : vector<1x32xf32> to vector<8x32xf32>
    %17 = arith.mulf %16, %14 : vector<8x32xf32>
    %cst_12 = arith.constant 2.000000e+00 : f32
    %18 = vector.broadcast %cst_12 : f32 to vector<8x32xf32>
    %19 = arith.mulf %18, %17 : vector<8x32xf32>
    %20 = arith.mulf %19, %8 : vector<8x32xf32>
    %21 = arith.subf %10, %20 : vector<8x32xf32>
    %22 = vector.broadcast %12 : vector<8x1xf32> to vector<8x32xf32>
    %23 = arith.mulf %22, %17 : vector<8x32xf32>
    %24 = arith.mulf %23, %17 : vector<8x32xf32>
    %25 = arith.addf %21, %24 : vector<8x32xf32>
    %26 = vector.broadcast %11 : vector<8x1xf32> to vector<8x32xf32>
    %27 = arith.mulf %25, %26 : vector<8x32xf32>
    %cst_13 = arith.constant 9.99999997E-7 : f32
    %28 = vector.broadcast %cst_13 : f32 to vector<8x32xf32>
    %29 = arith.addf %27, %28 : vector<8x32xf32>
    %30 = math.rsqrt %29 : vector<8x32xf32>
    %c0_14 = arith.constant 0 : index
    %c0_15 = arith.constant 0 : index
    %31 = vector.load %arg5[%c0_14, %c0_15] : memref<1x32xf32, #tpu.memory_space<vmem>>, vector<1x32xf32>
    %32 = vector.broadcast %31 : vector<1x32xf32> to vector<8x32xf32>
    %33 = arith.mulf %32, %30 : vector<8x32xf32>
    %c0_16 = arith.constant 0 : index
    %c0_17 = arith.constant 0 : index
    %34 = vector.load %arg7[%c0_16, %c0_17] : memref<1x32xf32, #tpu.memory_space<vmem>>, vector<1x32xf32>
    %35 = arith.mulf %17, %33 : vector<8x32xf32>
    %36 = vector.broadcast %34 : vector<1x32xf32> to vector<8x32xf32>
    %37 = arith.subf %36, %35 : vector<8x32xf32>
    %cst_18 = arith.constant dense<0.000000e+00> : vector<156x32xf32>
    %38 = tpu.matmul %7, %33, %cst_18 {dimension_numbers = #tpu.dot_dimension_numbers<[1], [0], [0], [1], [0, 0, 1, 1], [], []>, precision = #tpu.contract_precision<fp32>} : vector<156x8xf32>, vector<8x32xf32>, vector<156x32xf32> -> vector<156x32xf32>
    %cst_19 = arith.constant dense<0.000000e+00> : vector<156x32xf32>
    %39 = tpu.matmul %7, %37, %cst_19 {dimension_numbers = #tpu.dot_dimension_numbers<[1], [0], [0], [1], [0, 0, 1, 1], [], []>, precision = #tpu.contract_precision<fp32>} : vector<156x8xf32>, vector<8x32xf32>, vector<156x32xf32> -> vector<156x32xf32>
    %40 = arith.mulf %0, %38 : vector<156x32xf32>
    %41 = arith.addf %40, %39 : vector<156x32xf32>
    %c0_20 = arith.constant 0 : index
    %c0_21 = arith.constant 0 : index
    %42 = vector.load %arg8[%c0_20, %c0_21] : memref<156x32xf32, #tpu.memory_space<vmem>>, vector<156x32xf32>
    tpu.vector_store %arg8[%c0_20, %c0_21], %41 {strides = array<i32>} : memref<156x32xf32, #tpu.memory_space<vmem>>, vector<156x32xf32>,
    return
  }
  func.func @transform_0(%arg0: i32) -> (i32, i32) {
    %c0_i32 = arith.constant 0 : i32
    %c0_i32_0 = arith.constant 0 : i32
    %c0_i32_1 = arith.constant 0 : i32
    return %c0_i32, %c0_i32_0 : i32, i32
  }
  func.func @transform_1(%arg0: i32) -> (i32, i32) {
    %c0_i32 = arith.constant 0 : i32
    %c0_i32_0 = arith.constant 0 : i32
    %c0_i32_1 = arith.constant 0 : i32
    return %c0_i32, %c0_i32_0 : i32, i32
  }
  func.func @transform_2(%arg0: i32) -> (i32, i32) {
    %c0_i32 = arith.constant 0 : i32
    %c0_i32_0 = arith.constant 0 : i32
    %c0_i32_1 = arith.constant 0 : i32
    return %c0_i32, %c0_i32_0 : i32, i32
  }
  func.func @transform_3(%arg0: i32) -> (i32, i32) {
    %c0_i32 = arith.constant 0 : i32
    %c0_i32_0 = arith.constant 0 : i32
    %c0_i32_1 = arith.constant 0 : i32
    return %c0_i32, %c0_i32_0 : i32, i32
  }
  func.func @transform_4(%arg0: i32) -> (i32, i32) {
    %c0_i32 = arith.constant 0 : i32
    %c0_i32_0 = arith.constant 0 : i32
    %c0_i32_1 = arith.constant 0 : i32
    return %c0_i32, %c0_i32_0 : i32, i32
  }
  func.func @transform_5(%arg0: i32) -> (i32, i32) {
    %c0_i32 = arith.constant 0 : i32
    %c0_i32_0 = arith.constant 0 : i32
    %c0_i32_1 = arith.constant 0 : i32
    return %c0_i32, %c0_i32_0 : i32, i32
  }
  func.func @transform_6(%arg0: i32) -> (i32, i32) {
    %c0_i32 = arith.constant 0 : i32
    %c0_i32_0 = arith.constant 0 : i32
    %c0_i32_1 = arith.constant 0 : i32
    return %c0_i32, %c0_i32_0 : i32, i32
  }
  func.func @transform_7(%arg0: i32) -> (i32, i32) {
    %c0_i32 = arith.constant 0 : i32
    %c0_i32_0 = arith.constant 0 : i32
    %c0_i32_1 = arith.constant 0 : i32
    return %c0_i32, %c0_i32_0 : i32, i32
  }
}

</mosaic_0001>

<bundles_post_ra>
// kernel: tpu_custom_call.1
= control target key start
LH: loop header
LB: loop body
LE: loop exit
PB: predicated region body
PF: predicated region fallthrough
CT: control target
= control target key end

     0   :  { %v3109_v0 = vmov 0   ;;  %v66_v23 = vlaneseq  ;;  %v5118_v28 = vmov 0.0   ;;  %s5101_s1 = inlined_call_operand.vmem [shape: s32[156,1], index: 1, kind: input, shape index: {}]   ;;  %s5102_s2 = inlined_call_operand.vmem [shape: f32[8,1], index: 2, kind: input, shape index: {}]   ;;  %s5103_s3 = inlined_call_operand.vmem [shape: f32[8,1], index: 3, kind: input, shape index: {}]   ;;  %s5104_s0 = inlined_call_operand.vmem [shape: f32[156,32], index: 0, kind: input, shape index: {}]   ;;  %s5105_s5 = inlined_call_operand.vmem [shape: f32[1,32], index: 5, kind: input, shape index: {}]   ;;  %s5106_s4 = inlined_call_operand.vmem [shape: f32[1,32], index: 4, kind: input, shape index: {}]   ;;  %s5107_s6 = inlined_call_operand.vmem [shape: f32[1,32], index: 6, kind: input, shape index: {}]   ;;  %s5108_s7 = inlined_call_operand.vmem [shape: f32[156,32], index: 7, kind: output, shape index: {}]  }
   0x1   :  { %3083 = vset.pattern.permute.xlu2 %v3109_v0  ;;  %3082 = vset.pattern.permute.xlu1 %v3109_v0  ;;  %v50_v1 = vld [vmem:[%s5101_s1 + $0x20] sm:$0xff]  ;;  %v48_v2 = vld [vmem:[%s5101_s1 + $0x10] sm:$0xff]  ;;  %v51_v4 = vld [vmem:[%s5101_s1 + $0x28] sm:$0xff] }
   0x2   :  { %v46_v3 = vld [vmem:[%s5101_s1] sm:$0xff]  ;;  %3081 = vset.pattern.permute.xlu0 %v3109_v0  ;;  %81 = vperm.xlu2 %3083, %v50_v1   ;;  %v49_v5 = vld [vmem:[%s5101_s1 + $0x18] sm:$0xff]  ;;  %v47_v6 = vld [vmem:[%s5101_s1 + $0x8] sm:$0xff]  ;;  %v3217_v25 = vand.u32 127, %v66_v23 }
   0x3   :  { %75 = vperm.xlu1 %3082, %v48_v2   ;;  %69 = vperm.xlu0 %3081, %v46_v3   ;;  %v54_v7 = vld [vmem:[%s5101_s1 + $0x40] sm:$0xff]  ;;  %v53_v8 = vld [vmem:[%s5101_s1 + $0x38] sm:$0xff]  ;;  %v52_v9 = vld [vmem:[%s5101_s1 + $0x30] sm:$0xff] }
   0x4   :  { %v57_v10 = vld [vmem:[%s5101_s1 + $0x58] sm:$0xff]  ;;  %v56_v11 = vld [vmem:[%s5101_s1 + $0x50] sm:$0xff]  ;;  %v55_v12 = vld [vmem:[%s5101_s1 + $0x48] sm:$0xff] }
   0x5   :  { %v59_v13 = vld [vmem:[%s5101_s1 + $0x68] sm:$0xff]  ;;  %v62_v14 = vld [vmem:[%s5101_s1 + $0x80] sm:$0xff]  ;;  %v64_v16 = vld [vmem:[%s5101_s1 + $0x90] sm:$0xff] }
   0x6   :  { %v58_v15 = vld [vmem:[%s5101_s1 + $0x60] sm:$0xff]  ;;  %v60_v17 = vld [vmem:[%s5101_s1 + $0x70] sm:$0xff]  ;;  %v63_v18 = vld [vmem:[%s5101_s1 + $0x88] sm:$0xff] }
   0x7   :  { %v65_v19 = vld [vmem:[%s5101_s1 + $0x98] sm:$0xf]  ;;  %v1315_v21 = vld [vmem:[%s5102_s2] sm:$0xff]  ;;  %v3302_v59 = vld [vmem:[%s5104_s0 + $0x70] sm:$0xff] }
   0x8   :  { %v61_v20 = vld [vmem:[%s5101_s1 + $0x78] sm:$0xff]  ;;  %v1316_v22 = vld [vmem:[%s5103_s3] sm:$0xff]  ;;  %v3310_v61 = vand.u32 4294901760, %v3302_v59  ;;  %v3317_v62 = vld [vmem:[%s5104_s0 + $0x68] sm:$0xff] }
   0x9   :  { %v3294_v57 = vld [vmem:[%s5104_s0 + $0x78] sm:$0xff]  ;;  %v3325_v1 = vand.u32 4294901760, %v3317_v62  ;;  %v3335_v3 = vld [vmem:[%s5104_s0 + $0x60] sm:$0xff] }
   0xa   :  { %84 = vperm.xlu2 %3083, %v51_v4   ;;  %v3297_v58 = vand.u32 4294901760, %v3294_v57  ;;  %v3322_v0 = vsub.f32 %v3302_v59, %v3310_v61 }
   0xb   :  { %78 = vperm.xlu1 %3082, %v49_v5   ;;  %72 = vperm.xlu0 %3081, %v47_v6   ;;  %v3344_v6 = vsub.f32 %v3317_v62, %v3325_v1 }
   0xc   :  { %v3307_v60 = vsub.f32 %v3294_v57, %v3297_v58  ;;  %241 = vmatpush.msra.mxu0 %v3297_v58  ;;  %437 = vmatpush.msra.mxu3 %v3297_v58  ;;  %v5116_v5 = vand.u32 4294901760, %v3322_v0 }
   0xe   :  { %v5117_v63 = vand.u32 4294901760, %v3307_v60  ;;  %243 = vmatpush.msra.mxu0 %v3310_v61  ;;  %384 = vmatpush.msra.mxu2 %v3307_v60 }
   0xf   :  { %439 = vmatpush.msra.mxu3 %v3310_v61 }
  0x10   :  { %v284_v4 = vsub.f32 %v3307_v60, %v5117_v63  ;;  %245 = vmatpush.msra.mxu0 %v3325_v1  ;;  %387 = vmatpush.msra.mxu2 %v3322_v0 }
  0x11   :  { %441 = vmatpush.msra.mxu3 %v3325_v1 }
  0x12   :  { %93 = vperm.xlu2 %3083, %v54_v7   ;;  %v3347_v7 = vand.u32 4294901760, %v3335_v3  ;;  %390 = vmatpush.msra.mxu2 %v3344_v6 }
  0x13   :  { %90 = vperm.xlu1 %3082, %v53_v8   ;;  %87 = vperm.xlu0 %3081, %v52_v9   ;;  %v3355_v8 = vld [vmem:[%s5104_s0 + $0x58] sm:$0xff]  ;;  %v285_v9 = vand.u32 4294901760, %v284_v4 }
  0x14   :  { %247 = vmatpush.msra.mxu0 %v3347_v7  ;;  %443 = vmatpush.msra.mxu3 %v3347_v7 }
  0x15   :  { %286 = vmatpush.msra.mxu1 %v285_v9  ;;  %v3458_v9 = vld [vmem:[%s5104_s0 + $0x30] sm:$0xff] }
  0x1a   :  { %102 = vperm.xlu2 %3083, %v57_v10   ;;  %v290_v10 = vsub.f32 %v3322_v0, %v5116_v5 }
  0x1b   :  { %99 = vperm.xlu1 %3082, %v56_v11   ;;  %96 = vperm.xlu0 %3081, %v55_v12   ;;  %v5115_v11 = vand.u32 4294901760, %v3344_v6  ;;  %v3364_v12 = vsub.f32 %v3335_v3, %v3347_v7 }
  0x1d   :  { %393 = vmatpush.msra.mxu2 %v3364_v12 }
  0x22   :  { %108 = vperm.xlu2 %3083, %v59_v13   ;;  %v3371_v13 = vand.u32 4294901760, %v3355_v8 }
  0x23   :  { %117 = vperm.xlu1 %3082, %v62_v14   ;;  %105 = vperm.xlu0 %3081, %v58_v15   ;;  %v3376_v14 = vld [vmem:[%s5104_s0 + $0x50] sm:$0xff]  ;;  %v291_v15 = vand.u32 4294901760, %v290_v10 }
  0x24   :  { %249 = vmatpush.msra.mxu0 %v3371_v13  ;;  %445 = vmatpush.msra.mxu3 %v3371_v13 }
  0x25   :  { %292 = vmatpush.msra.mxu1 %v291_v15 }
  0x2a   :  { %123 = vperm.xlu2 %3083, %v64_v16   ;;  %v296_v16 = vsub.f32 %v3344_v6, %v5115_v11 }
  0x2b   :  { %111 = vperm.xlu1 %3082, %v60_v17   ;;  %120 = vperm.xlu0 %3081, %v63_v18   ;;  %v5113_v17 = vand.u32 4294901760, %v3364_v12  ;;  %v3384_v18 = vand.u32 4294901760, %v3376_v14 }
  0x2d   :  { %v3403_v23 = vsub.f32 %v3376_v14, %v3384_v18  ;;  %251 = vmatpush.msra.mxu0 %v3384_v18  ;;  %447 = vmatpush.msra.mxu3 %v3384_v18 }
  0x33   :  { %126 = vperm.xlu1 %3082, %v65_v19   ;;  %114 = vperm.xlu0 %3081, %v61_v20   ;;  %v3389_v19 = vsub.f32 %v3355_v8, %v3371_v13  ;;  %v3394_v20 = vld [vmem:[%s5104_s0 + $0x48] sm:$0xff] }
  0x35   :  { %396 = vmatpush.msra.mxu2 %v3389_v19 }
  0x37   :  { %399 = vmatpush.msra.mxu2 %v3403_v23 }
  0x3b   :  { %1319 = vperm.xlu1 %3082, %v1315_v21   ;;  %v297_v21 = vand.u32 4294901760, %v296_v16 }
  0x3d   :  { %298 = vmatpush.msra.mxu1 %v297_v21 }
  0x43   :  { %1333 = vperm.xlu1 %3082, %v1316_v22   ;;  %v302_v22 = vsub.f32 %v3364_v12, %v5113_v17 }
  0x5c   :  { %v82_v24 = vpop.permute.xlu2 %81 }
  0x5d   :  { %vm132_vm4 = vcmp.eq.s32.totalorder %v3217_v25, %v82_v24  ;;  %v3406_v24 = vand.u32 4294901760, %v3394_v20 }
  0x5e   :  { %v3250_v44 = vsel %vm132_vm4, 1.0, %v5118_v28  ;;  %vm236_vm4 = vcmask 1043456  }
  0x5f   :  { %5200 = vst [vmem:[#allocation5_spill] sm:$0xff] %v3250_v44  ;;  %253 = vmatpush.msra.mxu0 %v3406_v24  ;;  %449 = vmatpush.msra.mxu3 %v3406_v24 }
  0x64   :  { %v85_v30 = vpop.permute.xlu2 %84 }
  0x65   :  { %vm133_vm6 = vcmp.eq.s32.totalorder %v3217_v25, %v85_v30  ;;  %v3418_v30 = vld [vmem:[%s5104_s0 + $0x40] sm:$0xff] }
  0x66   :  { %v3262_v48 = vsel %vm133_vm6, 1.0, %v5118_v28  ;;  %vm1362_vm6 = vcmask 64512  }
  0x67   :  { %5202 = vst [vmem:[#allocation7_spill] sm:$0xff] %v3262_v48 }
  0x6c   :  { %v94_v34 = vpop.permute.xlu2 %93 }
  0x6d   :  { %vm136_vm12 = vcmp.eq.s32.totalorder %v3217_v25, %v94_v34  ;;  %v3425_v34 = vsub.f32 %v3394_v20, %v3406_v24 }
  0x6e   :  { %v3330_v2 = vsel %vm136_vm12, 1.0, %v5118_v28 }
  0x6f   :  { %5208 = vst [vmem:[#allocation13_spill] sm:$0xff] %v3330_v2  ;;  %402 = vmatpush.msra.mxu2 %v3425_v34 }
  0x74   :  { %v3234_v38 = vpop.permute.xlu2 %102 }
  0x75   :  { %v76_v26 = vpop.permute.xlu1 %75  ;;  %v70_v27 = vpop.permute.xlu0 %69  ;;  %vm139_vm15 = vcmp.eq.s32.totalorder %v3217_v25, %v3234_v38 }
  0x76   :  { %vm128_vm0 = vcmp.eq.s32.totalorder %v3217_v25, %v70_v27  ;;  %vm130_vm2 = vcmp.eq.s32.totalorder %v3217_v25, %v76_v26  ;;  %v5112_v27 = vand.u32 4294901760, %v3389_v19 }
  0x77   :  { %v3221_v29 = vsel %vm128_vm0, 1.0, %v5118_v28  ;;  %v3231_v37 = vsel %vm130_vm2, 1.0, %v5118_v28 }
  0x78   :  { %168 = vxpose.xlu2.b32.start [1/16] (narrow) %v3221_v29, 8  ;;  %5198 = vst [vmem:[#allocation3_spill] sm:$0xff] %v3231_v37 }
  0x7c   :  { %v3252_v45 = vpop.permute.xlu2 %108 }
  0x7d   :  { %v79_v31 = vpop.permute.xlu1 %78  ;;  %v73_v32 = vpop.permute.xlu0 %72 }
  0x7e   :  { %vm129_vm1 = vcmp.eq.s32.totalorder %v3217_v25, %v73_v32  ;;  %vm131_vm3 = vcmp.eq.s32.totalorder %v3217_v25, %v79_v31  ;;  %v303_v31 = vand.u32 4294901760, %v302_v22  ;;  %v5110_v32 = vand.u32 4294901760, %v3403_v23 }
  0x7f   :  { %v3226_v33 = vsel %vm129_vm1, 1.0, %v5118_v28  ;;  %v3242_v41 = vsel %vm131_vm3, 1.0, %v5118_v28  ;;  %v3472_v22 = vand.u32 4294901760, %v3458_v9  ;;  %vm141_vm1 = vcmp.eq.s32.totalorder %v3217_v25, %v3252_v45 }
  0x80   :  { %5197 = vst [vmem:[#allocation2_spill] sm:$0xff] %v3226_v33  ;;  %169 = vxpose.xlu2.b32.cont [2/16] (narrow) %v3226_v33, 8  ;;  %304 = vmatpush.msra.mxu1 %v303_v31  ;;  %v3477_v31 = vld [vmem:[%s5104_s0 + $0x28] sm:$0xff] }
  0x81   :  { %5199 = vst [vmem:[#allocation4_spill] sm:$0xff] %v3242_v41 }
  0x84   :  { %v124_v51 = vpop.permute.xlu2 %123 }
  0x85   :  { %v91_v35 = vpop.permute.xlu1 %90  ;;  %v88_v36 = vpop.permute.xlu0 %87  ;;  %vm146_vm8 = vcmp.eq.s32.totalorder %v3217_v25, %v124_v51 }
  0x86   :  { %vm134_vm9 = vcmp.eq.s32.totalorder %v3217_v25, %v88_v36  ;;  %v3274_v52 = vsel %vm146_vm8, 1.0, %v5118_v28  ;;  %vm135_vm10 = vcmp.eq.s32.totalorder %v3217_v25, %v91_v35  ;;  %v3428_v35 = vand.u32 4294901760, %v3418_v30 }
  0x87   :  { %5204 = vst [vmem:[#allocation9_spill] sm:$0xff] %v3274_v52  ;;  %v3277_v53 = vsel %vm134_vm9, 1.0, %v5118_v28  ;;  %v3284_v55 = vsel %vm135_vm10, 1.0, %v5118_v28  ;;  %v308_v36 = vsub.f32 %v3389_v19, %v5112_v27  ;;  %vm2933_vm10 = vcmask 261120  }
  0x88   :  { %170 = vxpose.xlu2.b32.cont [3/16] (narrow) %v3231_v37, 8  ;;  %5205 = vst [vmem:[#allocation10_spill] sm:$0xff] %v3277_v53  ;;  %v3447_v51 = vsub.f32 %v3418_v30, %v3428_v35  ;;  %255 = vmatpush.msra.mxu0 %v3428_v35  ;;  %v5215_v37 = vand.u32 4294901760, %v3322_v0  ;;  %v5220_v0 = vand.u32 4294901760, %v3403_v23 }
  0x89   :  { %5206 = vst [vmem:[#allocation11_spill] sm:$0xff] %v3284_v55  ;;  %v309_v4 = vand.u32 4294901760, %v308_v36  ;;  %451 = vmatpush.msra.mxu3 %v3428_v35 }
  0x8a   :  { %v5111_v16 = vand.u32 4294901760, %v3447_v51  ;;  %405 = vmatpush.msra.mxu2 %v3447_v51  ;;  %v5222_v45 = vand.u32 4294901760, %v3447_v51 }
  0x8b   :  { %310 = vmatpush.msra.mxu1 %v309_v4 }
  0x8d   :  { %v3237_v39 = vpop.permute.xlu1 %99  ;;  %v3239_v40 = vpop.permute.xlu0 %96 }
  0x8e   :  { %vm137_vm13 = vcmp.eq.s32.totalorder %v3217_v25, %v3239_v40  ;;  %v3438_v40 = vld [vmem:[%s5104_s0 + $0x38] sm:$0xff]  ;;  %vm138_vm14 = vcmp.eq.s32.totalorder %v3217_v25, %v3237_v39 }
  0x8f   :  { %v3412_v26 = vsel %vm137_vm13, 1.0, %v5118_v28  ;;  %v3493_v4 = vsel %vm138_vm14, 1.0, %v5118_v28 }
  0x90   :  { %171 = vxpose.xlu2.b32.cont [4/16] (narrow) %v3242_v41, 8  ;;  %5209 = vst [vmem:[#allocation14_spill] sm:$0xff] %v3412_v26  ;;  %v5214_v41 = vand.u32 4294901760, %v3307_v60  ;;  %v5217_v60 = vand.u32 4294901760, %v3364_v12 }
  0x91   :  { %5210 = vst [vmem:[#allocation15_spill] sm:$0xff] %v3493_v4 }
  0x95   :  { %v118_v42 = vpop.permute.xlu1 %117  ;;  %v3246_v43 = vpop.permute.xlu0 %105 }
  0x96   :  { %vm144_vm5 = vcmp.eq.s32.totalorder %v3217_v25, %v118_v42  ;;  %v314_v42 = vsub.f32 %v3403_v23, %v5110_v32  ;;  %v3485_v32 = vand.u32 4294901760, %v3477_v31  ;;  %vm140_vm0 = vcmp.eq.s32.totalorder %v3217_v25, %v3246_v43  ;;  %v3711_v23 = vld [vmem:[%s5104_s0 + $0x88] sm:$0xff] }
  0x97   :  { %v3255_v46 = vsel %vm144_vm5, 1.0, %v5118_v28  ;;  %vm232_vm5 = vcmask 228352  }
  0x98   :  { %5201 = vst [vmem:[#allocation6_spill] sm:$0xff] %v3255_v46  ;;  %200 = vxpose.xlu0.b32.start [1/4] (short) (narrow) %v3255_v46, 8  ;;  %172 = vxpose.xlu2.b32.cont [5/16] (narrow) %v3250_v44, 8  ;;  %v315_v10 = vand.u32 4294901760, %v314_v42  ;;  %v326_v42 = vsub.f32 %v3447_v51, %v5111_v16  ;;  %v3502_v16 = vld [vmem:[%s5104_s0 + $0x20] sm:$0xff]  ;;  %v3510_v39 = vsub.f32 %v3477_v31, %v3485_v32  ;;  %v3561_v46 = vld [vmem:[%s5104_s0 + $0x8] sm:$0xff] }
  0x99   :  { %v3726_v51 = vld [vmem:[%s5104_s0 + $0x80] sm:$0xff] }
  0x9a   :  { %316 = vmatpush.msra.mxu1 %v315_v10  ;;  %v327_v27 = vand.u32 4294901760, %v326_v42  ;;  %v3513_v10 = vand.u32 4294901760, %v3502_v16  ;;  %v5129_v5 = vand.u32 4294901760, %v3510_v39 }
  0x9c   :  { %v3527_v63 = vsub.f32 %v3502_v16, %v3513_v10 }
  0x9d   :  { %v121_v47 = vpop.permute.xlu0 %120  ;;  %v3264_v49 = vpop.permute.xlu1 %111 }
  0x9e   :  { %vm145_vm7 = vcmp.eq.s32.totalorder %v3217_v25, %v121_v47  ;;  %v5109_v47 = vand.u32 4294901760, %v3425_v34  ;;  %vm142_vm2 = vcmp.eq.s32.totalorder %v3217_v25, %v3264_v49  ;;  %v5226_v49 = vand.u32 4294901760, %v3510_v39 }
  0x9f   :  { %v3267_v50 = vsel %vm145_vm7, 1.0, %v5118_v28  ;;  %v5227_v12 = vand.u32 4294901760, %v3527_v63 }
  0xa0   :  { %5203 = vst [vmem:[#allocation8_spill] sm:$0xff] %v3267_v50  ;;  %173 = vxpose.xlu2.b32.cont [6/16] (narrow) %v3262_v48, 8  ;;  %201 = vxpose.xlu0.b32.cont [2/4] (short) (narrow) %v3267_v50, 8  ;;  %v320_v15 = vsub.f32 %v3425_v34, %v5109_v47 }
  0xa2   :  { %v321_v36 = vand.u32 4294901760, %v320_v15  ;;  %v3497_v15 = vsub.f32 %v3458_v9, %v3472_v22 }
  0xa4   :  { %322 = vmatpush.msra.mxu1 %v321_v36  ;;  %v5126_v42 = vand.u32 4294901760, %v3497_v15  ;;  %v3542_v36 = vld [vmem:[%s5104_s0 + $0x10] sm:$0xff] }
  0xa5   :  { %v127_v54 = vpop.permute.xlu1 %126  ;;  %v3554_v50 = vand.u32 4294901760, %v3542_v36 }
  0xa6   :  { %vm147_vm11 = vcmp.eq.s32.totalorder %v3217_v25, %v127_v54  ;;  %v3450_v54 = vand.u32 4294901760, %v3438_v40  ;;  %328 = vmatpush.msra.mxu1 %v327_v27 }
  0xa7   :  { %v3287_v56 = vsel %vm147_vm11, 1.0, %v5118_v28  ;;  %vm2953_vm11 = vcmask 257024  }
  0xa8   :  { %174 = vxpose.xlu2.b32.cont [7/16] (narrow) %v3277_v53, 8  ;;  %202 = vxpose.xlu0.b32.cont [3/4] (short) (narrow) %v3274_v52, 8  ;;  %5207 = vst [vmem:[#allocation12_spill] sm:$0xff] %v3287_v56  ;;  %v3468_v21 = vsub.f32 %v3438_v40, %v3450_v54  ;;  %v5136_v52 = vand.u32 4294901760, %v3527_v63 }
  0xa9   :  { %257 = vmatpush.msra.mxu0 %v3450_v54  ;;  %453 = vmatpush.msra.mxu3 %v3450_v54 }
  0xaa   :  { %v5114_v47 = vand.u32 4294901760, %v3468_v21  ;;  %408 = vmatpush.msra.mxu2 %v3468_v21 }
  0xab   :  { %259 = vmatpush.msra.mxu0 %v3472_v22  ;;  %455 = vmatpush.msra.mxu3 %v3472_v22 }
  0xac   :  { %v332_v17 = vsub.f32 %v3468_v21, %v5114_v47  ;;  %v3522_v47 = vld [vmem:[%s5104_s0 + $0x18] sm:$0xff]  ;;  %411 = vmatpush.msra.mxu2 %v3497_v15 }
  0xad   :  { %v3530_v28 = vand.u32 4294901760, %v3522_v47  ;;  %261 = vmatpush.msra.mxu0 %v3485_v32  ;;  %457 = vmatpush.msra.mxu3 %v3485_v32 }
  0xae   :  { %v333_v11 = vand.u32 4294901760, %v332_v17  ;;  %v338_v17 = vsub.f32 %v3497_v15, %v5126_v42  ;;  %414 = vmatpush.msra.mxu2 %v3510_v39 }
  0xaf   :  { %v3551_v27 = vsub.f32 %v3522_v47, %v3530_v28  ;;  %263 = vmatpush.msra.mxu0 %v3513_v10  ;;  %459 = vmatpush.msra.mxu3 %v3513_v10 }
  0xb0   :  { %175 = vxpose.xlu2.b32.cont [8/16] (narrow) %v3284_v55, 8  ;;  %203 = vxpose.xlu0.b32.end [4/4] (short) (narrow) %v3287_v56, 8  ;;  %v344_v56 = vsub.f32 %v3510_v39, %v5129_v5  ;;  %v339_v42 = vand.u32 4294901760, %v338_v17 }
  0xb1   :  { %334 = vmatpush.msra.mxu1 %v333_v11  ;;  %265 = vmatpush.msra.mxu0 %v3530_v28  ;;  %v5211_v11 = vmov 0.0   ;;  %v5213_v55 = vand.u32 4294901760, %v3551_v27 }
  0xb2   :  { %v345_v5 = vand.u32 4294901760, %v344_v56  ;;  %417 = vmatpush.msra.mxu2 %v3527_v63  ;;  %v3578_v17 = vsel %vm139_vm15, 1.0, %v5211_v11  ;;  %v3581_v56 = vand.u32 4294901760, %v3561_v46  ;;  %461 = vmatpush.msra.mxu3 %v3530_v28  ;;  %v3628_v33 = vsel %vm140_vm0, 1.0, %v5211_v11 }
  0xb3   :  { %5212 = vst [vmem:[#allocation16_spill] sm:$0xff] %v3578_v17  ;;  %340 = vmatpush.msra.mxu1 %v339_v42  ;;  %v356_v53 = vsub.f32 %v3551_v27, %v5213_v55  ;;  %267 = vmatpush.msra.mxu0 %v3554_v50 }
  0xb4   :  { %420 = vmatpush.msra.mxu2 %v3551_v27  ;;  %v3601_v42 = vsub.f32 %v3561_v46, %v3581_v56  ;;  %463 = vmatpush.msra.mxu3 %v3554_v50 }
  0xb5   :  { %346 = vmatpush.msra.mxu1 %v345_v5  ;;  %269 = vmatpush.msra.mxu0 %v3581_v56 }
  0xb6   :  { %v367_v5 = vand.u32 4294901760, %v3601_v42  ;;  %465 = vmatpush.msra.mxu3 %v3581_v56 }
  0xb8   :  { %176 = vxpose.xlu2.b32.cont [9/16] (narrow) %v3330_v2, 8  ;;  %v3570_v2 = vsub.f32 %v3542_v36, %v3554_v50 }
  0xba   :  { %v5147_v38 = vand.u32 4294901760, %v3570_v2  ;;  %423 = vmatpush.msra.mxu2 %v3570_v2 }
  0xbc   :  { %v362_v55 = vsub.f32 %v3570_v2, %v5147_v38  ;;  %v368_v38 = vsub.f32 %v3601_v42, %v367_v5  ;;  %426 = vmatpush.msra.mxu2 %v3601_v42  ;;  %v778_v42 = vmul.f32 %v3335_v3, %v3335_v3  ;;  %v777_v3 = vmul.f32 %v3355_v8, %v3355_v8 }
  0xc0   :  { %177 = vxpose.xlu2.b32.cont [10/16] (narrow) %v3412_v26, 8 }
  0xc8   :  { %178 = vxpose.xlu2.b32.cont [11/16] (narrow) %v3493_v4, 8  ;;  %v350_v4 = vsub.f32 %v3527_v63, %v5136_v52  ;;  %v3586_v52 = vld [vmem:[%s5104_s0] sm:$0xff] }
  0xc9   :  { %v3594_v48 = vand.u32 4294901760, %v3586_v52 }
  0xca   :  { %v351_v26 = vand.u32 4294901760, %v350_v4  ;;  %v357_v4 = vand.u32 4294901760, %v356_v53 }
  0xcb   :  { %v3608_v44 = vsub.f32 %v3586_v52, %v3594_v48  ;;  %271 = vmatpush.msra.mxu0 %v3594_v48  ;;  %467 = vmatpush.msra.mxu3 %v3594_v48 }
  0xcc   :  { %352 = vmatpush.msra.mxu1 %v351_v26 }
  0xcd   :  { %v373_v53 = vand.u32 4294901760, %v3608_v44  ;;  %478 = vmatpush.msrb.mxu0 %v5214_v41  ;;  %429 = vmatpush.msra.mxu2 %v3608_v44  ;;  %v5216_v41 = vand.u32 4294901760, %v3344_v6  ;;  %v5225_v6 = vand.u32 4294901760, %v3497_v15  ;;  %v3740_v15 = vand.u32 4294901760, %v3726_v51 }
  0xce   :  { %358 = vmatpush.msra.mxu1 %v357_v4 }
  0xcf   :  { %v374_v26 = vsub.f32 %v3608_v44, %v373_v53  ;;  %482 = vmatpush.msrb.mxu0 %v5215_v37  ;;  %v5218_v37 = vand.u32 4294901760, %v3389_v19  ;;  %v3644_v44 = vsel %vm141_vm1, 1.0, %v5211_v11  ;;  %v5230_v19 = vand.u32 4294901760, %v3570_v2 }
  0xd0   :  { %179 = vxpose.xlu2.b32.cont [12/16] (narrow) %v3578_v17, 8  ;;  %v363_v17 = vand.u32 4294901760, %v362_v55  ;;  %v369_v55 = vand.u32 4294901760, %v368_v38  ;;  %5219 = vst [vmem:[#allocation17_spill] sm:$0xff] %v3644_v44 }
  0xd1   :  { %v375_v43 = vand.u32 4294901760, %v374_v26  ;;  %486 = vmatpush.msrb.mxu0 %v5216_v41 }
  0xd2   :  { %364 = vmatpush.msra.mxu1 %v363_v17 }
  0xd3   :  { %490 = vmatpush.msrb.mxu0 %v5217_v60  ;;  %v3780_v60 = vand.u32 4294901760, %v778_v42 }
  0xd4   :  { %370 = vmatpush.msra.mxu1 %v369_v55 }
  0xd5   :  { %494 = vmatpush.msrb.mxu0 %v5218_v37  ;;  %v776_v37 = vmul.f32 %v3376_v14, %v3376_v14  ;;  %v775_v14 = vmul.f32 %v3394_v20, %v3394_v20 }
  0xd6   :  { %376 = vmatpush.msra.mxu1 %v375_v43 }
  0xd7   :  { %498 = vmatpush.msrb.mxu0 %v5220_v0 }
  0xd8   :  { %180 = vxpose.xlu2.b32.cont [13/16] (narrow) %v3628_v33, 8  ;;  %545 = vmatpush.msrb.mxu1 %v3297_v58  ;;  %v5221_v58 = vand.u32 4294901760, %v3425_v34 }
  0xda   :  { %547 = vmatpush.msrb.mxu1 %v3310_v61  ;;  %502 = vmatpush.msrb.mxu0 %v5221_v58  ;;  %v5223_v61 = vand.u32 4294901760, %v3468_v21 }
  0xdc   :  { %549 = vmatpush.msrb.mxu1 %v3325_v1  ;;  %506 = vmatpush.msrb.mxu0 %v5222_v45  ;;  %v3662_v1 = vsel %vm142_vm2, 1.0, %v5211_v11  ;;  %v3795_v45 = vand.u32 4294901760, %v777_v3 }
  0xdd   :  { %5224 = vst [vmem:[#allocation18_spill] sm:$0xff] %v3662_v1 }
  0xde   :  { %551 = vmatpush.msrb.mxu1 %v3347_v7  ;;  %510 = vmatpush.msrb.mxu0 %v5223_v61  ;;  %v115_v7 = vpop.permute.xlu0 %114 }
  0xdf   :  { %vm143_vm3 = vcmp.eq.s32.totalorder %v3217_v25, %v115_v7  ;;  %v45_v25 = vld [vmem:[%s5104_s0 + $0x98] sm:$0xf] }
  0xe0   :  { %181 = vxpose.xlu2.b32.cont [14/16] (narrow) %v3644_v44, 8  ;;  %553 = vmatpush.msrb.mxu1 %v3371_v13  ;;  %v5228_v13 = vand.u32 4294901760, %v3551_v27  ;;  %v238_v63 = vsel %vm236_vm4, %v45_v25, 0  ;;  %v785_v7 = vmul.f32 %v45_v25, %v45_v25  ;;  %v773_v25 = vmul.f32 %v3438_v40, %v3438_v40 }
  0xe1   :  { %514 = vmatpush.msrb.mxu0 %v5225_v6  ;;  %v3694_v2 = vand.u32 4294901760, %v238_v63 }
  0xe2   :  { %555 = vmatpush.msrb.mxu1 %v3384_v18  ;;  %v3679_v18 = vsel %vm143_vm3, 1.0, %v5211_v11 }
  0xe3   :  { %518 = vmatpush.msrb.mxu0 %v5226_v49  ;;  %5229 = vst [vmem:[#allocation19_spill] sm:$0xff] %v3679_v18  ;;  %594 = vmatpush.msrb.mxu2 %v3694_v2 }
  0xe4   :  { %557 = vmatpush.msrb.mxu1 %v3406_v24  ;;  %v781_v24 = vmul.f32 %v3294_v57, %v3294_v57 }
  0xe5   :  { %522 = vmatpush.msrb.mxu0 %v5227_v12  ;;  %v3806_v12 = vand.u32 4294901760, %v776_v37 }
  0xe6   :  { %559 = vmatpush.msrb.mxu1 %v3428_v35  ;;  %v3721_v35 = vand.u32 4294901760, %v3711_v23 }
  0xe7   :  { %526 = vmatpush.msrb.mxu0 %v5228_v13  ;;  %v774_v13 = vmul.f32 %v3418_v30, %v3418_v30  ;;  %v3827_v30 = vsub.f32 %v778_v42, %v3780_v60  ;;  %v770_v42 = vmul.f32 %v3502_v16, %v3502_v16  ;;  %v769_v16 = vmul.f32 %v3522_v47, %v3522_v47 }
  0xe8   :  { %182 = vxpose.xlu2.b32.cont [15/16] (narrow) %v3662_v1, 8  ;;  %561 = vmatpush.msrb.mxu1 %v3450_v54  ;;  %v780_v54 = vmul.f32 %v3302_v59, %v3302_v59  ;;  %v779_v59 = vmul.f32 %v3317_v62, %v3317_v62  ;;  %v3760_v62 = vsub.f32 %v3726_v51, %v3740_v15 }
  0xe9   :  { %530 = vmatpush.msrb.mxu0 %v5230_v19  ;;  %v3817_v19 = vand.u32 4294901760, %v775_v14 }
  0xea   :  { %563 = vmatpush.msrb.mxu1 %v3472_v22  ;;  %v3737_v22 = vsub.f32 %v3711_v23, %v3721_v35  ;;  %v3754_v38 = vand.u32 4294901760, %v780_v54  ;;  %v3770_v26 = vand.u32 4294901760, %v779_v59  ;;  %v5154_v55 = vand.u32 4294901760, %v3760_v62 }
  0xeb   :  { %534 = vmatpush.msrb.mxu0 %v367_v5 }
  0xec   :  { %565 = vmatpush.msrb.mxu1 %v3485_v32  ;;  %v643_v8 = vsub.f32 %v3760_v62, %v5154_v55  ;;  %v3804_v49 = vsub.f32 %v780_v54, %v3754_v38  ;;  %v3815_v20 = vsub.f32 %v779_v59, %v3770_v26  ;;  %v772_v54 = vmul.f32 %v3458_v9, %v3458_v9 }
  0xed   :  { %538 = vmatpush.msrb.mxu0 %v373_v53  ;;  %v771_v59 = vmul.f32 %v3477_v31, %v3477_v31 }
  0xee   :  { %567 = vmatpush.msrb.mxu1 %v3513_v10  ;;  %v3743_v10 = vand.u32 4294901760, %v781_v24  ;;  %v644_v61 = vand.u32 4294901760, %v643_v8  ;;  %v768_v8 = vmul.f32 %v3542_v36, %v3542_v36 }
  0xf0   :  { %183 = vxpose.xlu2.b32.end [16/16] (narrow) %v3679_v18, 8  ;;  %569 = vmatpush.msrb.mxu1 %v3530_v28  ;;  %v3699_v28 = vld [vmem:[%s5104_s0 + $0x90] sm:$0xff]  ;;  %v3793_v58 = vsub.f32 %v781_v24, %v3743_v10  ;;  %v3829_v24 = vand.u32 4294901760, %v774_v13 }
  0xf1   :  { %v784_v40 = vmul.f32 %v3699_v28, %v3699_v28 }
  0xf2   :  { %571 = vmatpush.msrb.mxu1 %v3554_v50  ;;  %v3702_v50 = vsub.f32 %v238_v63, %v3694_v2  ;;  %v787_v63 = vsel %vm236_vm4, %v785_v7, 0  ;;  %v767_v7 = vmul.f32 %v3561_v46, %v3561_v46 }
  0xf3   :  { %v3846_v9 = vand.u32 4294901760, %v787_v63  ;;  %v3860_v31 = vand.u32 4294901760, %v784_v40 }
  0xf4   :  { %573 = vmatpush.msrb.mxu1 %v3581_v56  ;;  %v5157_v32 = vand.u32 4294901760, %v3702_v50  ;;  %v5155_v56 = vand.u32 4294901760, %v3737_v22 }
  0xf6   :  { %575 = vmatpush.msrb.mxu1 %v3594_v48  ;;  %v3706_v48 = vand.u32 4294901760, %v3699_v28  ;;  %v625_v57 = vsub.f32 %v3702_v50, %v5157_v32  ;;  %v637_v53 = vsub.f32 %v3737_v22, %v5155_v56 }
  0xf8   :  { %v3718_v34 = vsub.f32 %v3699_v28, %v3706_v48  ;;  %596 = vmatpush.msrb.mxu2 %v3706_v48  ;;  %v626_v27 = vand.u32 4294901760, %v625_v57  ;;  %v638_v41 = vand.u32 4294901760, %v637_v53  ;;  %v3836_v57 = vsub.f32 %v777_v3, %v3795_v45 }
  0xf9   :  { %v783_v28 = vmul.f32 %v3711_v23, %v3711_v23  ;;  %v3865_v23 = vsub.f32 %v775_v14, %v3817_v19  ;;  %v3871_v53 = vand.u32 4294901760, %v771_v59  ;;  %v3876_v3 = vsub.f32 %v787_v63, %v3846_v9 }
  0xfa   :  { %v5156_v21 = vand.u32 4294901760, %v3718_v34  ;;  %598 = vmatpush.msrb.mxu2 %v3721_v35  ;;  %627 = vmatpush.msrb.mxu3 %v626_v27  ;;  %v3851_v27 = vsub.f32 %v776_v37, %v3806_v12  ;;  %v3885_v37 = vand.u32 4294901760, %v770_v42 }
  0xfc   :  { %v631_v17 = vsub.f32 %v3718_v34, %v5156_v21  ;;  %600 = vmatpush.msrb.mxu2 %v3740_v15 }
  0xfe   :  { %v632_v5 = vand.u32 4294901760, %v631_v17  ;;  %v3856_v17 = vand.u32 4294901760, %v772_v54 }
 0x100   :  { %633 = vmatpush.msrb.mxu3 %v632_v5  ;;  %v782_v5 = vmul.f32 %v3726_v51, %v3726_v51  ;;  %v3878_v51 = vand.u32 4294901760, %v783_v28  ;;  %v3908_v63 = vsub.f32 %v772_v54, %v3856_v17  ;;  %v3923_v54 = vsub.f32 %v771_v59, %v3871_v53 }
 0x102   :  { %639 = vmatpush.msrb.mxu3 %v638_v41  ;;  %v3881_v41 = vsub.f32 %v774_v13, %v3829_v24  ;;  %v3892_v47 = vand.u32 4294901760, %v782_v5  ;;  %v5158_v13 = vand.u32 4294901760, %v3876_v3  ;;  %v3905_v36 = vsub.f32 %v783_v28, %v3878_v51 }
 0x103   :  { %v3925_v28 = vand.u32 4294901760, %v767_v7 }
 0x104   :  { %645 = vmatpush.msrb.mxu3 %v644_v61  ;;  %v3899_v61 = vand.u32 4294901760, %v769_v16  ;;  %v3918_v46 = vsub.f32 %v782_v5, %v3892_v47  ;;  %v1174_v56 = vsub.f32 %v3876_v3, %v5158_v13  ;;  %v3934_v5 = vsub.f32 %v770_v42, %v3885_v37 }
 0x105   :  { %v5231_v18 = vand.u32 4294901760, %v3905_v36 }
 0x106   :  { %v3945_v13 = vsub.f32 %v769_v16, %v3899_v61  ;;  %v5232_v1 = vand.u32 4294901760, %v3918_v46 }
 0x107   :  { %v1186_v42 = vsub.f32 %v3905_v36, %v5231_v18 }
 0x108   :  { %v1192_v44 = vsub.f32 %v3918_v46, %v5232_v1 }
 0x109   :  { %v1187_v18 = vand.u32 4294901760, %v1186_v42  ;;  %v850_v42 = vand.u32 4294901760, %v3827_v30 }
 0x111   :  { %v184_v39 = vpop.trf.xlu2 }
 0x112   :  { %v3747_v11 = vand.u32 4294901760, %v184_v39 }
 0x114   :  { %v3763_v4 = vsub.f32 %v184_v39, %v3747_v11  ;;  %378 = vmatmul.f32.vlgmr.msra.gmra.mxu1 %v3747_v11  ;;  %v3842_v39 = vand.u32 4294901760, %v773_v25 }
 0x115   :  { %986 = vmatpush.msra.mxu1 %v3743_v10 }
 0x116   :  { %v3776_v43 = vand.u32 4294901760, %v3763_v4  ;;  %432 = vmatmul.f32.vlgmr.msra.gmra.mxu2 %v3763_v4  ;;  %v3895_v14 = vsub.f32 %v773_v25, %v3842_v39  ;;  %v3912_v25 = vand.u32 4294901760, %v768_v8 }
 0x117   :  { %988 = vmatpush.msra.mxu1 %v3754_v38  ;;  %665 = vmatpush.msra.mxu2 %v3702_v50 }
 0x118   :  { %v275_v0 = vsub.f32 %v3763_v4, %v3776_v43  ;;  %471 = vmatmul.f32.vlgmr.msra.gmra.mxu3 %v3776_v43 }
 0x119   :  { %990 = vmatpush.msra.mxu1 %v3770_v26  ;;  %668 = vmatpush.msra.mxu2 %v3718_v34 }
 0x11a   :  { %v3799_v6 = vand.u32 4294901760, %v275_v0  ;;  %694 = vmatpush.msra.mxu3 %v3694_v2  ;;  %v3890_v0 = vsub.f32 %v784_v40, %v3860_v31  ;;  %v766_v40 = vmul.f32 %v3586_v52, %v3586_v52  ;;  %v1175_v52 = vand.u32 4294901760, %v1174_v56 }
 0x11b   :  { %992 = vmatpush.msra.mxu1 %v3780_v60  ;;  %671 = vmatpush.msra.mxu2 %v3737_v22  ;;  %v3961_v56 = vsub.f32 %v767_v7, %v3925_v28 }
 0x11c   :  { %277 = vmatmul.f32.vlgmr.msra.gmra.mxu0 %v3799_v6  ;;  %577 = vmatmul.f32.vlgmr.msrb.gmra.mxu1 %v3747_v11  ;;  %v5161_v55 = vand.u32 4294901760, %v3890_v0  ;;  %v3936_v21 = vand.u32 4294901760, %v766_v40 }
 0x11d   :  { %933 = vmatpush.msra.mxu0 %v3793_v58  ;;  %994 = vmatpush.msra.mxu1 %v3795_v45 }
 0x11e   :  { %696 = vmatpush.msra.mxu3 %v3706_v48  ;;  %674 = vmatpush.msra.mxu2 %v3760_v62  ;;  %v1180_v59 = vsub.f32 %v3890_v0, %v5161_v55  ;;  %v3953_v55 = vsub.f32 %v768_v8, %v3912_v25  ;;  %v3965_v16 = vsub.f32 %v766_v40, %v3936_v21  ;;  %v1193_v8 = vand.u32 4294901760, %v1192_v44 }
 0x11f   :  { %936 = vmatpush.msra.mxu0 %v3804_v49  ;;  %996 = vmatpush.msra.mxu1 %v3806_v12  ;;  %v5166_v44 = vand.u32 4294901760, %v3804_v49 }
 0x120   :  { %698 = vmatpush.msra.mxu3 %v3721_v35  ;;  %v1181_v32 = vand.u32 4294901760, %v1180_v59 }
 0x121   :  { %939 = vmatpush.msra.mxu0 %v3815_v20  ;;  %998 = vmatpush.msra.mxu1 %v3817_v19 }
 0x122   :  { %700 = vmatpush.msra.mxu3 %v3740_v15 }
 0x123   :  { %942 = vmatpush.msra.mxu0 %v3827_v30  ;;  %1000 = vmatpush.msra.mxu1 %v3829_v24 }
 0x124   :  { %540 = vmatmul.f32.vlgmr.msrb.gmra.mxu0 %v3747_v11 }
 0x125   :  { %945 = vmatpush.msra.mxu0 %v3836_v57  ;;  %1002 = vmatpush.msra.mxu1 %v3842_v39 }
 0x127   :  { %948 = vmatpush.msra.mxu0 %v3851_v27  ;;  %1004 = vmatpush.msra.mxu1 %v3856_v17 }
 0x129   :  { %951 = vmatpush.msra.mxu0 %v3865_v23  ;;  %1006 = vmatpush.msra.mxu1 %v3871_v53 }
 0x12b   :  { %954 = vmatpush.msra.mxu0 %v3881_v41  ;;  %1008 = vmatpush.msra.mxu1 %v3885_v37 }
 0x12d   :  { %957 = vmatpush.msra.mxu0 %v3895_v14  ;;  %1010 = vmatpush.msra.mxu1 %v3899_v61 }
 0x12f   :  { %960 = vmatpush.msra.mxu0 %v3908_v63  ;;  %1012 = vmatpush.msra.mxu1 %v3912_v25 }
 0x131   :  { %963 = vmatpush.msra.mxu0 %v3923_v54  ;;  %1014 = vmatpush.msra.mxu1 %v3925_v28 }
 0x133   :  { %966 = vmatpush.msra.mxu0 %v3934_v5  ;;  %1016 = vmatpush.msra.mxu1 %v3936_v21 }
 0x134   :  { %1020 = vmatmul.f32.vlgmr.msra.gmra.mxu1 %v3776_v43 }
 0x135   :  { %969 = vmatpush.msra.mxu0 %v3945_v13  ;;  %1176 = vmatpush.msrb.mxu1 %v1175_v52  ;;  %v844_v52 = vand.u32 4294901760, %v3815_v20 }
 0x137   :  { %972 = vmatpush.msra.mxu0 %v3953_v55  ;;  %1182 = vmatpush.msrb.mxu1 %v1181_v32  ;;  %v832_v32 = vand.u32 4294901760, %v3793_v58 }
 0x139   :  { %975 = vmatpush.msra.mxu0 %v3961_v56  ;;  %1188 = vmatpush.msrb.mxu1 %v1187_v18 }
 0x13b   :  { %978 = vmatpush.msra.mxu0 %v3965_v16  ;;  %1194 = vmatpush.msrb.mxu1 %v1193_v8 }
 0x13c   :  { %v216_v1 = vpop.trf.xlu0  ;;  %981 = vmatmul.f32.vlgmr.msra.gmra.mxu0 %v3763_v4  ;;  %v833_v4 = vsub.f32 %v3793_v58, %v832_v32 }
 0x13d   :  { %1243 = vmatpush.msra.mxu1 %v3846_v9  ;;  %v234_v43 = vsel %vm232_vm5, %v216_v1, 0  ;;  %1143 = vmatpush.msrb.mxu0 %v3846_v9  ;;  %v856_v1 = vand.u32 4294901760, %v3836_v57 }
 0x13e   :  { %v3973_v7 = vand.u32 4294901760, %v234_v43  ;;  %v834_v8 = vand.u32 4294901760, %v833_v4 }
 0x13f   :  { %1245 = vmatpush.msra.mxu1 %v3860_v31  ;;  %1145 = vmatpush.msrb.mxu0 %v3860_v31 }
 0x140   :  { %v3979_v40 = vsub.f32 %v234_v43, %v3973_v7  ;;  %647 = vmatmul.f32.vlgmr.msrb.gmra.mxu3 %v3973_v7  ;;  %1196 = vmatmul.f32.vlgmr.msrb.gmra.mxu1 %v3973_v7 }
 0x141   :  { %754 = vmatpush.msrb.mxu3 %v3694_v2  ;;  %1147 = vmatpush.msrb.mxu0 %v3878_v51  ;;  %v839_v2 = vsub.f32 %v3804_v49, %v5166_v44 }
 0x142   :  { %1247 = vmatpush.msra.mxu1 %v3878_v51  ;;  %v603_v59 = vand.u32 4294901760, %v3979_v40 }
 0x143   :  { %756 = vmatpush.msrb.mxu3 %v3706_v48  ;;  %1149 = vmatpush.msrb.mxu0 %v3892_v47  ;;  %v845_v48 = vsub.f32 %v3815_v20, %v844_v52  ;;  %v840_v44 = vand.u32 4294901760, %v839_v2 }
 0x144   :  { %1249 = vmatpush.msra.mxu1 %v3892_v47  ;;  %v604_v18 = vsub.f32 %v3979_v40, %v603_v59 }
 0x145   :  { %1214 = vmatpush.msra.mxu0 %v3876_v3  ;;  %758 = vmatpush.msrb.mxu3 %v3721_v35  ;;  %v851_v35 = vsub.f32 %v3827_v30, %v850_v42  ;;  %v846_v4 = vand.u32 4294901760, %v845_v48  ;;  %v874_v48 = vand.u32 4294901760, %v3881_v41 }
 0x146   :  { %1303 = vmatpush.msrb.mxu1 %v3846_v9  ;;  %v605_v43 = vand.u32 4294901760, %v604_v18  ;;  %v862_v9 = vand.u32 4294901760, %v3851_v27  ;;  %v857_v18 = vsub.f32 %v3836_v57, %v856_v1 }
 0x147   :  { %1217 = vmatpush.msra.mxu0 %v3890_v0  ;;  %760 = vmatpush.msrb.mxu3 %v3740_v15  ;;  %v868_v15 = vand.u32 4294901760, %v3865_v23  ;;  %v852_v2 = vand.u32 4294901760, %v851_v35  ;;  %v5235_v35 = vand.u32 4294901760, %v3737_v22 }
 0x148   :  { %1305 = vmatpush.msrb.mxu1 %v3860_v31  ;;  %606 = vmatmul.f32.vlgmr.msrb.gmra.mxu2 %v605_v43  ;;  %v5233_v31 = vand.u32 4294901760, %v3702_v50  ;;  %v858_v50 = vand.u32 4294901760, %v857_v18  ;;  %v886_v18 = vand.u32 4294901760, %v3908_v63 }
 0x149   :  { %704 = vmatmul.f32.vlgmr.msra.gmra.mxu3 %v603_v59  ;;  %1155 = vmatmul.f32.vlgmr.msrb.gmra.mxu0 %v605_v43  ;;  %v5234_v43 = vand.u32 4294901760, %v3718_v34  ;;  %v5236_v34 = vand.u32 4294901760, %v3876_v3 }
 0x14a   :  { %835 = vmatpush.msra.mxu3 %v834_v8  ;;  %1253 = vmatmul.f32.vlgmr.msra.gmra.mxu1 %v603_v59  ;;  %v863_v8 = vsub.f32 %v3851_v27, %v862_v9  ;;  %v880_v59 = vand.u32 4294901760, %v3895_v14 }
 0x14b   :  { %723 = vmatpush.msrb.mxu2 %v5233_v31  ;;  %1220 = vmatpush.msra.mxu0 %v3905_v36  ;;  %v5237_v31 = vand.u32 4294901760, %v3760_v62 }
 0x14c   :  { %841 = vmatpush.msra.mxu3 %v840_v44  ;;  %1307 = vmatpush.msrb.mxu1 %v3878_v51  ;;  %v869_v44 = vsub.f32 %v3865_v23, %v868_v15  ;;  %v864_v51 = vand.u32 4294901760, %v863_v8  ;;  %v881_v3 = vsub.f32 %v3895_v14, %v880_v59  ;;  %v898_v8 = vand.u32 4294901760, %v3934_v5 }
 0x14d   :  { %727 = vmatpush.msrb.mxu2 %v5234_v43  ;;  %1223 = vmatpush.msra.mxu0 %v3918_v46  ;;  %v5238_v43 = vand.u32 4294901760, %v3890_v0 }
 0x14e   :  { %847 = vmatpush.msra.mxu3 %v846_v4  ;;  %1309 = vmatpush.msrb.mxu1 %v3892_v47  ;;  %v875_v4 = vsub.f32 %v3881_v41, %v874_v48  ;;  %v870_v22 = vand.u32 4294901760, %v869_v44  ;;  %v892_v47 = vand.u32 4294901760, %v3923_v54  ;;  %v904_v44 = vand.u32 4294901760, %v3945_v13 }
 0x14f   :  { %731 = vmatpush.msrb.mxu2 %v5235_v35  ;;  %1272 = vmatpush.msrb.mxu0 %v5236_v34  ;;  %v5239_v35 = vand.u32 4294901760, %v3905_v36  ;;  %v899_v0 = vsub.f32 %v3934_v5, %v898_v8 }
 0x150   :  { %853 = vmatpush.msra.mxu3 %v852_v2  ;;  %677 = vmatmul.f32.vlgmr.msra.gmra.mxu2 %v3979_v40  ;;  %v876_v62 = vand.u32 4294901760, %v875_v4  ;;  %v887_v2 = vsub.f32 %v3908_v63, %v886_v18  ;;  %v5240_v4 = vand.u32 4294901760, %v3918_v46  ;;  %v905_v36 = vsub.f32 %v3945_v13, %v904_v44 }
 0x151   :  { %735 = vmatpush.msrb.mxu2 %v5237_v31  ;;  %762 = vmatmul.f32.vlgmr.msrb.gmra.mxu3 %v3973_v7 }
 0x152   :  { %859 = vmatpush.msra.mxu3 %v858_v50  ;;  %1226 = vmatmul.f32.vlgmr.msra.gmra.mxu0 %v3979_v40  ;;  %v882_v50 = vand.u32 4294901760, %v881_v3  ;;  %v893_v40 = vsub.f32 %v3923_v54, %v892_v47  ;;  %v888_v34 = vand.u32 4294901760, %v887_v2  ;;  %v900_v3 = vand.u32 4294901760, %v899_v0 }
 0x153   :  { %790 = vmatpush.msra.mxu2 %v3743_v10  ;;  %1311 = vmatmul.f32.vlgmr.msrb.gmra.mxu1 %v3973_v7  ;;  %v906_v2 = vand.u32 4294901760, %v905_v36 }
 0x154   :  { %865 = vmatpush.msra.mxu3 %v864_v51  ;;  %1276 = vmatpush.msrb.mxu0 %v5238_v43  ;;  %v910_v51 = vand.u32 4294901760, %v3953_v55  ;;  %v894_v31 = vand.u32 4294901760, %v893_v40 }
 0x155   :  { %792 = vmatpush.msra.mxu2 %v3754_v38 }
 0x156   :  { %871 = vmatpush.msra.mxu3 %v870_v22  ;;  %1280 = vmatpush.msrb.mxu0 %v5239_v35  ;;  %v916_v22 = vand.u32 4294901760, %v3961_v56  ;;  %v911_v46 = vsub.f32 %v3953_v55, %v910_v51 }
 0x157   :  { %794 = vmatpush.msra.mxu2 %v3770_v26 }
 0x158   :  { %877 = vmatpush.msra.mxu3 %v876_v62  ;;  %1284 = vmatpush.msrb.mxu0 %v5240_v4  ;;  %v922_v62 = vand.u32 4294901760, %v3965_v16  ;;  %v917_v43 = vsub.f32 %v3961_v56, %v916_v22 }
 0x159   :  { %796 = vmatpush.msra.mxu2 %v3780_v60 }
 0x15a   :  { %737 = vmatmul.f32.vlgmr.msrb.gmra.mxu2 %v3973_v7  ;;  %883 = vmatpush.msra.mxu3 %v882_v50  ;;  %v912_v50 = vand.u32 4294901760, %v911_v46  ;;  %v918_v40 = vand.u32 4294901760, %v917_v43 }
 0x15b   :  { %798 = vmatpush.msra.mxu2 %v3795_v45  ;;  %1286 = vmatmul.f32.vlgmr.msrb.gmra.mxu0 %v3973_v7  ;;  %v923_v7 = vsub.f32 %v3965_v16, %v922_v62 }
 0x15c   :  { %889 = vmatpush.msra.mxu3 %v888_v34 }
 0x15d   :  { %800 = vmatpush.msra.mxu2 %v3806_v12  ;;  %v924_v35 = vand.u32 4294901760, %v923_v7 }
 0x15e   :  { %895 = vmatpush.msra.mxu3 %v894_v31 }
 0x15f   :  { %802 = vmatpush.msra.mxu2 %v3817_v19 }
 0x160   :  { %901 = vmatpush.msra.mxu3 %v900_v3 }
 0x161   :  { %804 = vmatpush.msra.mxu2 %v3829_v24 }
 0x162   :  { %907 = vmatpush.msra.mxu3 %v906_v2 }
 0x163   :  { %806 = vmatpush.msra.mxu2 %v3842_v39 }
 0x164   :  { %913 = vmatpush.msra.mxu3 %v912_v50 }
 0x165   :  { %808 = vmatpush.msra.mxu2 %v3856_v17 }
 0x166   :  { %919 = vmatpush.msra.mxu3 %v918_v40 }
 0x167   :  { %810 = vmatpush.msra.mxu2 %v3871_v53 }
 0x168   :  { %925 = vmatpush.msra.mxu3 %v924_v35  ;;  %v1364_v35 = vsel %vm1362_vm6, %v3221_v29, 0 }
 0x169   :  { %812 = vmatpush.msra.mxu2 %v3885_v37  ;;  %927 = vmatmul.f32.vlgmr.msra.gmra.mxu3 %v3747_v11 }
 0x16a   :  { %1094 = vmatpush.msrb.mxu3 %v3743_v10  ;;  %v5241_v10 = vand.u32 4294901760, %v3804_v49 }
 0x16b   :  { %814 = vmatpush.msra.mxu2 %v3899_v61 }
 0x16c   :  { %1096 = vmatpush.msrb.mxu3 %v3754_v38 }
 0x16d   :  { %816 = vmatpush.msra.mxu2 %v3912_v25 }
 0x16e   :  { %1098 = vmatpush.msrb.mxu3 %v3770_v26 }
 0x16f   :  { %818 = vmatpush.msra.mxu2 %v3925_v28 }
 0x170   :  { %1100 = vmatpush.msrb.mxu3 %v3780_v60 }
 0x171   :  { %820 = vmatpush.msra.mxu2 %v3936_v21 }
 0x172   :  { %826 = vmatmul.f32.vlgmr.msra.gmra.mxu2 %v3799_v6  ;;  %1102 = vmatpush.msrb.mxu3 %v3795_v45 }
 0x173   :  { %1027 = vmatpush.msrb.mxu2 %v832_v32  ;;  %v1320_v32 = vpop.permute.xlu1 %1319 }
 0x174   :  { %1104 = vmatpush.msrb.mxu3 %v3806_v12 }
 0x175   :  { %1031 = vmatpush.msrb.mxu2 %v5241_v10 }
 0x176   :  { %1106 = vmatpush.msrb.mxu3 %v3817_v19 }
 0x177   :  { %1035 = vmatpush.msrb.mxu2 %v844_v52 }
 0x178   :  { %1108 = vmatpush.msrb.mxu3 %v3829_v24 }
 0x179   :  { %1039 = vmatpush.msrb.mxu2 %v850_v42 }
 0x17a   :  { %1110 = vmatpush.msrb.mxu3 %v3842_v39 }
 0x17b   :  { %1043 = vmatpush.msrb.mxu2 %v856_v1 }
 0x17c   :  { %1112 = vmatpush.msrb.mxu3 %v3856_v17 }
 0x17d   :  { %1047 = vmatpush.msrb.mxu2 %v862_v9 }
 0x17e   :  { %1114 = vmatpush.msrb.mxu3 %v3871_v53 }
 0x17f   :  { %1051 = vmatpush.msrb.mxu2 %v868_v15  ;;  %v3084_v15 = vld [vmem:[%s5105_s5] ss:$0 sm:$0xff] }
 0x180   :  { %1116 = vmatpush.msrb.mxu3 %v3885_v37 }
 0x181   :  { %1055 = vmatpush.msrb.mxu2 %v874_v48 }
 0x182   :  { %1118 = vmatpush.msrb.mxu3 %v3899_v61 }
 0x183   :  { %1059 = vmatpush.msrb.mxu2 %v880_v59 }
 0x184   :  { %1120 = vmatpush.msrb.mxu3 %v3912_v25 }
 0x185   :  { %1063 = vmatpush.msrb.mxu2 %v886_v18 }
 0x186   :  { %1122 = vmatpush.msrb.mxu3 %v3925_v28 }
 0x187   :  { %1067 = vmatpush.msrb.mxu2 %v892_v47 }
 0x188   :  { %1124 = vmatpush.msrb.mxu3 %v3936_v21 }
 0x189   :  { %1071 = vmatpush.msrb.mxu2 %v898_v8  ;;  %1126 = vmatmul.f32.vlgmr.msrb.gmra.mxu3 %v3747_v11 }
 0x18b   :  { %1075 = vmatpush.msrb.mxu2 %v904_v44 }
 0x18d   :  { %1079 = vmatpush.msrb.mxu2 %v910_v51  ;;  %v1334_v51 = vpop.permute.xlu1 %1333 }
 0x18f   :  { %1083 = vmatpush.msrb.mxu2 %v916_v22 }
 0x191   :  { %1087 = vmatpush.msrb.mxu2 %v922_v62  ;;  %v379_v21 = vpop.f32.mrf.mxu1 }
 0x192   :  { %1089 = vmatmul.f32.vlgmr.msrb.gmra.mxu2 %v3747_v11 }
 0x199   :  { %v433_v38 = vpop.f32.mrf.mxu2  ;;  %v278_v45 = vpop.f32.mrf.mxu0 }
 0x19a   :  { %v380_v6 = vadd.f32 %v379_v21, %v278_v45  ;;  %v578_v30 = vpop.f32.mrf.mxu1  ;;  %v3085_v45 = vld [vmem:[%s5106_s4] ss:$0 sm:$0xff] }
 0x19b   :  { %v472_v26 = vpop.f32.mrf.mxu3 }
 0x19c   :  { %v434_v49 = vadd.f32 %v433_v38, %v380_v6  ;;  %v5242_v6 = vld [vmem:[#allocation2_spill] sm:$0xff] }
 0x19e   :  { %v473_v19 = vadd.f32 %v472_v26, %v434_v49  ;;  %v4150_v26 = vsub.f32 %v1364_v35, %v1364_v35  ;;  %v1367_v49 = vsel %vm1362_vm6, %v5242_v6, 0 }
 0x1a0   :  { %v4153_v21 = vand.u32 4294901760, %v4150_v26 }
 0x1a1   :  { %v541_v24 = vpop.f32.mrf.mxu0 }
 0x1a2   :  { %v542_v57 = vadd.f32 %v541_v24, %v473_v19  ;;  %v1443_v19 = vsub.f32 %v4150_v26, %v4153_v21 }
 0x1a4   :  { %v579_v39 = vadd.f32 %v578_v30, %v542_v57  ;;  %v4162_v30 = vsub.f32 %v1367_v49, %v1367_v49  ;;  %v3086_v57 = vld [vmem:[%s5107_s6] ss:$0 sm:$0xff] }
 0x1b1   :  { %v1021_v23 = vpop.f32.mrf.mxu1 }
 0x1b9   :  { %v982_v11 = vpop.f32.mrf.mxu0 }
 0x1bd   :  { %v1197_v25 = vpop.f32.mrf.mxu1 }
 0x1c3   :  { %v648_v58 = vpop.f32.mrf.mxu3 }
 0x1c6   :  { %v1156_v13 = vpop.f32.mrf.mxu0 }
 0x1c7   :  { %v1254_v59 = vpop.f32.mrf.mxu1 }
 0x1cb   :  { %v607_v60 = vpop.f32.mrf.mxu2 }
 0x1cc   :  { %v705_v20 = vpop.f32.mrf.mxu3  ;;  %v608_v17 = vadd.f32 %v607_v60, %v579_v39 }
 0x1ce   :  { %v649_v53 = vadd.f32 %v648_v58, %v608_v17  ;;  %v4170_v17 = vand.u32 4294901760, %v4162_v30 }
 0x1cf   :  { %v1227_v42 = vpop.f32.mrf.mxu0 }
 0x1d0   :  { %v1312_v22 = vpop.f32.mrf.mxu1 }
 0x1d3   :  { %v678_v12 = vpop.f32.mrf.mxu2 }
 0x1d4   :  { %v763_v27 = vpop.f32.mrf.mxu3  ;;  %v679_v37 = vadd.f32 %v678_v12, %v649_v53  ;;  %v5243_v53 = vld [vmem:[#allocation3_spill] sm:$0xff] }
 0x1d6   :  { %v706_v63 = vadd.f32 %v705_v20, %v679_v37 }
 0x1d8   :  { %v1287_v4 = vpop.f32.mrf.mxu0 }
 0x1dd   :  { %v738_v55 = vpop.f32.mrf.mxu2 }
 0x1de   :  { %v739_v54 = vadd.f32 %v738_v55, %v706_v63 }
 0x1e0   :  { %v764_v5 = vadd.f32 %v763_v27, %v739_v54  ;;  %v4167_v27 = vand.u32 4294901760, %v1443_v19 }
 0x1e2   :  { %v1322_v9 = vmul.f32 %v1320_v32, %v764_v5 }
 0x1e4   :  { %v1327_v47 = vmul.f32 %v3084_v15, %v1322_v9 }
 0x1e6   :  { %v1328_v34 = vmul.f32 2.0, %v1327_v47  ;;  %v1336_v31 = vmul.f32 %v1334_v51, %v1327_v47 }
 0x1e8   :  { %v1329_v3 = vmul.f32 %v1328_v34, %v764_v5  ;;  %v1337_v62 = vmul.f32 %v1336_v31, %v1327_v47 }
 0x1ec   :  { %v928_v14 = vpop.f32.mrf.mxu3 }
 0x1f5   :  { %v827_v41 = vpop.f32.mrf.mxu2 }
 0x1f6   :  { %v929_v61 = vadd.f32 %v928_v14, %v827_v41  ;;  %v1370_v41 = vsel %vm1362_vm6, %v5243_v53, 0 }
 0x1f8   :  { %v983_v28 = vadd.f32 %v982_v11, %v929_v61  ;;  %v1451_v61 = vsub.f32 %v4162_v30, %v4170_v17 }
 0x1fa   :  { %v1022_v56 = vadd.f32 %v1021_v23, %v983_v28  ;;  %v4181_v5 = vand.u32 4294901760, %v1451_v61 }
 0x20c   :  { %v1127_v1 = vpop.f32.mrf.mxu3 }
 0x215   :  { %v1090_v16 = vpop.f32.mrf.mxu2 }
 0x216   :  { %v1091_v52 = vadd.f32 %v1090_v16, %v1022_v56 }
 0x218   :  { %v1128_v48 = vadd.f32 %v1127_v1, %v1091_v52 }
 0x21a   :  { %v1157_v18 = vadd.f32 %v1156_v13, %v1128_v48  ;;  %v4179_v13 = vsub.f32 %v1370_v41, %v1370_v41  ;;  %v5263_v41 = vld [vmem:[#allocation15_spill] sm:$0xff] }
 0x21c   :  { %v1198_v8 = vadd.f32 %v1197_v25, %v1157_v18  ;;  %v4184_v56 = vand.u32 4294901760, %v4179_v13 }
 0x21e   :  { %v1228_v44 = vadd.f32 %v1227_v42, %v1198_v8  ;;  %v1459_v1 = vsub.f32 %v4179_v13, %v4184_v56 }
 0x220   :  { %v1255_v0 = vadd.f32 %v1254_v59, %v1228_v44  ;;  %v4197_v15 = vand.u32 4294901760, %v1459_v1  ;;  %v5246_v59 = vld [vmem:[#allocation5_spill] sm:$0xff] }
 0x221   :  { %v1376_v18 = vsel %vm1362_vm6, %v5246_v59, 0 }
 0x222   :  { %v1288_v36 = vadd.f32 %v1287_v4, %v1255_v0  ;;  %v4211_v8 = vsub.f32 %v1376_v18, %v1376_v18  ;;  %v5248_v0 = vld [vmem:[#allocation7_spill] sm:$0xff]  ;;  %v1400_v18 = vsel %vm1362_vm6, %v3628_v33, 0 }
 0x223   :  { %v1379_v51 = vsel %vm1362_vm6, %v5248_v0, 0 }
 0x224   :  { %v1313_v46 = vadd.f32 %v1312_v22, %v1288_v36  ;;  %v4216_v34 = vand.u32 4294901760, %v4211_v8  ;;  %v4227_v31 = vsub.f32 %v1379_v51, %v1379_v51  ;;  %v4339_v51 = vsub.f32 %v1400_v18, %v1400_v18 }
 0x226   :  { %v1330_v2 = vsub.f32 %v1313_v46, %v1329_v3  ;;  %5247 = vst [vmem:[#allocation3_spill] sm:$0xff] %v4216_v34  ;;  %v1475_v4 = vsub.f32 %v4211_v8, %v4216_v34  ;;  %v4232_v22 = vand.u32 4294901760, %v4227_v31  ;;  %v5251_v3 = vld [vmem:[#allocation10_spill] sm:$0xff] }
 0x227   :  { %v1382_v46 = vsel %vm1362_vm6, %v5251_v3, 0  ;;  %5269 = vst [vmem:[#allocation25_spill] sm:$0xff] %v4339_v51 }
 0x228   :  { %v1338_v43 = vadd.f32 %v1337_v62, %v1330_v2  ;;  %v4229_v36 = vand.u32 4294901760, %v1475_v4  ;;  %5250 = vst [vmem:[#allocation5_spill] sm:$0xff] %v4232_v22  ;;  %v1483_v62 = vsub.f32 %v4227_v31, %v4232_v22  ;;  %v4243_v2 = vsub.f32 %v1382_v46, %v1382_v46 }
 0x229   :  { %v4344_v46 = vand.u32 4294901760, %v4339_v51 }
 0x22a   :  { %v1339_v50 = vmul.f32 %v1338_v43, %v1320_v32  ;;  %v5244_v32 = vld [vmem:[#allocation4_spill] sm:$0xff]  ;;  %5252 = vst [vmem:[#allocation7_spill] sm:$0xff] %v4243_v2  ;;  %v4245_v43 = vand.u32 4294901760, %v1483_v62  ;;  %v5271_v62 = vld [vmem:[#allocation17_spill] sm:$0xff] }
 0x22b   :  { %v1373_v52 = vsel %vm1362_vm6, %v5244_v32, 0  ;;  %5249 = vst [vmem:[#allocation4_spill] sm:$0xff] %v4227_v31 }
 0x22c   :  { %v1340_v7 = vadd.f32 1e-06, %v1339_v50  ;;  %v4195_v9 = vsub.f32 %v1373_v52, %v1373_v52  ;;  %v4248_v50 = vand.u32 4294901760, %v4243_v2  ;;  %5270 = vst [vmem:[#allocation26_spill] sm:$0xff] %v4344_v46 }
 0x22e   :  { %3087 = vrsqrt.f32 %v1340_v7  ;;  %vm1347_vm8 = vweird.f32 %v1340_v7  ;;  %v4200_v48 = vand.u32 4294901760, %v4195_v9  ;;  %5253 = vst [vmem:[#allocation10_spill] sm:$0xff] %v4248_v50  ;;  %v1491_v35 = vsub.f32 %v4243_v2, %v4248_v50 }
 0x230   :  { %5245 = vst [vmem:[#allocation2_spill] sm:$0xff] %v4200_v48 }
 0x234   :  { %v3088_v40 = vpop.eup %3087 }
 0x235   :  { %v1342_v10 = vmul.f32 %v3088_v40, %v1340_v7  ;;  %vm1348_vm7 = vweird.f32 %v3088_v40  ;;  %v5254_v7 = vld [vmem:[#allocation11_spill] sm:$0xff] }
 0x236   :  { %vm1349_vm9 = vmor %vm1347_vm8, %vm1348_vm7 }
 0x237   :  { %v1343_v38 = vmul.f32 %v3088_v40, %v1342_v10 }
 0x239   :  { %v1344_v60 = vmul.f32 0.5, %v1343_v38  ;;  %v4261_v38 = vand.u32 4294901760, %v1491_v35  ;;  %v1539_v35 = vsub.f32 %v4339_v51, %v4344_v46 }
 0x23b   :  { %v1345_v58 = vsub.f32 1.5, %v1344_v60 }
 0x23d   :  { %v1346_v12 = vmul.f32 %v3088_v40, %v1345_v58  ;;  %v5257_v58 = vld [vmem:[#allocation13_spill] sm:$0xff] }
 0x23f   :  { %v1350_v20 = vsel %vm1349_vm9, %v3088_v40, %v1346_v12  ;;  %v1385_v40 = vsel %vm1362_vm6, %v5254_v7, 0 }
 0x240   :  { %v1355_v24 = vmul.f32 %v3085_v45, %v1350_v20  ;;  %v4259_v10 = vsub.f32 %v1385_v40, %v1385_v40  ;;  %v1388_v45 = vsel %vm1362_vm6, %v5257_v58, 0  ;;  %v1403_v40 = vsel %vm1362_vm6, %v5271_v62, 0 }
 0x241   :  { %v4275_v12 = vsub.f32 %v1388_v45, %v1388_v45  ;;  %v4355_v45 = vsub.f32 %v1403_v40, %v1403_v40 }
 0x242   :  { %v1438_v55 = vand.u32 4294901760, %v1355_v24  ;;  %v1357_v39 = vmul.f32 %v1355_v24, %v1327_v47  ;;  %v1467_v47 = vsub.f32 %v4195_v9, %v4200_v48  ;;  %5255 = vst [vmem:[#allocation11_spill] sm:$0xff] %v4259_v10  ;;  %v4264_v60 = vand.u32 4294901760, %v4259_v10 }
 0x243   :  { %5258 = vst [vmem:[#allocation13_spill] sm:$0xff] %v4275_v12  ;;  %v4280_v19 = vand.u32 4294901760, %v4275_v12 }
 0x244   :  { %1439 = vmatpush.msra.mxu0 %v1438_v55  ;;  %1838 = vmatpush.msra.mxu3 %v1438_v55  ;;  %v1617_v23 = vsub.f32 %v1355_v24, %v1438_v55  ;;  %v1361_v11 = vsub.f32 %v3086_v57, %v1357_v39  ;;  %v4213_v44 = vand.u32 4294901760, %v1467_v47  ;;  %5256 = vst [vmem:[#allocation20_spill] sm:$0xff] %v4264_v60  ;;  %v5260_v24 = vld [vmem:[#allocation14_spill] sm:$0xff] }
 0x245   :  { %1445 = vmatmul.f32.vlgmr.msra.gmra.mxu0 %v4167_v27  ;;  %1842 = vmatmul.f32.vlgmr.msra.gmra.mxu3 %v4153_v21  ;;  %v1499_v49 = vsub.f32 %v4259_v10, %v4264_v60  ;;  %5259 = vst [vmem:[#allocation21_spill] sm:$0xff] %v4280_v19  ;;  %v1391_v57 = vsel %vm1362_vm6, %v5260_v24, 0 }
 0x246   :  { %1720 = vmatpush.msra.mxu2 %v1617_v23  ;;  %v1618_v37 = vand.u32 4294901760, %v1617_v23  ;;  %v2173_v14 = vand.u32 4294901760, %v1361_v11  ;;  %v4291_v39 = vsub.f32 %v1391_v57, %v1391_v57  ;;  %5272 = vst [vmem:[#allocation17_spill] sm:$0xff] %v4355_v45  ;;  %v4360_v57 = vand.u32 4294901760, %v4355_v45 }
 0x247   :  { %1723 = vmatmul.f32.vlgmr.msra.gmra.mxu2 %v4150_v26  ;;  %v4277_v20 = vand.u32 4294901760, %v1499_v49  ;;  %v4357_v49 = vand.u32 4294901760, %v1539_v35 }
 0x248   :  { %1978 = vmatpush.msrb.mxu0 %v1618_v37  ;;  %2174 = vmatpush.msrb.mxu2 %v2173_v14  ;;  %v2352_v63 = vsub.f32 %v1361_v11, %v2173_v14  ;;  %v1619_v25 = vsub.f32 %v1617_v23, %v1618_v37  ;;  %5261 = vst [vmem:[#allocation14_spill] sm:$0xff] %v4291_v39  ;;  %v4296_v11 = vand.u32 4294901760, %v4291_v39  ;;  %v1394_v37 = vsel %vm1362_vm6, %v5263_v41, 0 }
 0x249   :  { %v4307_v61 = vsub.f32 %v1394_v37, %v1394_v37  ;;  %5273 = vst [vmem:[#allocation27_spill] sm:$0xff] %v4360_v57 }
 0x24a   :  { %2455 = vmatpush.msra.mxu0 %v2352_v63  ;;  %v1620_v54 = vand.u32 4294901760, %v1619_v25  ;;  %v2353_v28 = vand.u32 4294901760, %v2352_v63  ;;  %5262 = vst [vmem:[#allocation22_spill] sm:$0xff] %v4296_v11 }
 0x24b   :  { %5264 = vst [vmem:[#allocation15_spill] sm:$0xff] %v4307_v61  ;;  %v4312_v25 = vand.u32 4294901760, %v4307_v61 }
 0x24c   :  { %1621 = vmatpush.msra.mxu1 %v1620_v54  ;;  %2713 = vmatpush.msra.mxu2 %v2353_v28  ;;  %v2354_v16 = vsub.f32 %v2352_v63, %v2353_v28  ;;  %v5266_v54 = vld [vmem:[#allocation16_spill] sm:$0xff] }
 0x24d   :  { %1453 = vmatmul.f32.gmra.mxu0 %v4181_v5  ;;  %2959 = vmatmul.msk.f32.vlgmr.msra.gmra.mxu1 %vm1362_vm6, %v3221_v29  ;;  %5265 = vst [vmem:[#allocation23_spill] sm:$0xff] %v4312_v25  ;;  %v1397_v28 = vsel %vm1362_vm6, %v5266_v54, 0 }
 0x24e   :  { %1848 = vmatmul.f32.gmra.mxu3 %v4170_v17  ;;  %2076 = vmatpush.msrb.mxu1 %v1438_v55  ;;  %v2355_v42 = vand.u32 4294901760, %v2354_v16  ;;  %v1507_v55 = vsub.f32 %v4275_v12, %v4280_v19  ;;  %v1523_v16 = vsub.f32 %v4307_v61, %v4312_v25  ;;  %v4323_v52 = vsub.f32 %v1397_v28, %v1397_v28 }
 0x24f   :  { %1728 = vmatmul.f32.gmra.mxu2 %v4162_v30 }
 0x250   :  { %2573 = vmatpush.msra.mxu1 %v2173_v14  ;;  %2356 = vmatpush.msrb.mxu3 %v2355_v42  ;;  %v4293_v23 = vand.u32 4294901760, %v1507_v55  ;;  %5267 = vst [vmem:[#allocation16_spill] sm:$0xff] %v4323_v52  ;;  %v4325_v42 = vand.u32 4294901760, %v1523_v16  ;;  %v4328_v1 = vand.u32 4294901760, %v4323_v52  ;;  %v5274_v55 = vld [vmem:[#allocation18_spill] sm:$0xff] }
 0x251   :  { %v1406_v37 = vsel %vm1362_vm6, %v5274_v55, 0 }
 0x252   :  { %2811 = vmatpush.msra.mxu3 %v2173_v14  ;;  %v1515_v14 = vsub.f32 %v4291_v39, %v4296_v11  ;;  %5268 = vst [vmem:[#allocation24_spill] sm:$0xff] %v4328_v1  ;;  %v1531_v47 = vsub.f32 %v4323_v52, %v4328_v1  ;;  %v4371_v28 = vsub.f32 %v1406_v37, %v1406_v37 }
 0x254   :  { %v4309_v63 = vand.u32 4294901760, %v1515_v14  ;;  %v4341_v4 = vand.u32 4294901760, %v1531_v47  ;;  %v1547_v14 = vsub.f32 %v4355_v45, %v4360_v57  ;;  %5275 = vst [vmem:[#allocation18_spill] sm:$0xff] %v4371_v28  ;;  %v4376_v18 = vand.u32 4294901760, %v4371_v28  ;;  %v5277_v47 = vld [vmem:[#allocation19_spill] sm:$0xff] }
 0x255   :  { %1461 = vmatmul.f32.gmra.mxu0 %v4197_v15  ;;  %2960 = vmatmul.msk.f32.gmra.mxu1 %vm1362_vm6, %v5242_v6  ;;  %v1409_v40 = vsel %vm1362_vm6, %v5277_v47, 0 }
 0x256   :  { %1854 = vmatmul.f32.gmra.mxu3 %v4184_v56  ;;  %v4373_v16 = vand.u32 4294901760, %v1547_v14  ;;  %5276 = vst [vmem:[#allocation28_spill] sm:$0xff] %v4376_v18  ;;  %v1555_v35 = vsub.f32 %v4371_v28, %v4376_v18  ;;  %v4387_v37 = vsub.f32 %v1409_v40, %v1409_v40 }
 0x257   :  { %1733 = vmatmul.f32.gmra.mxu2 %v4179_v13 }
 0x258   :  { %5278 = vst [vmem:[#allocation19_spill] sm:$0xff] %v4387_v37  ;;  %v4389_v14 = vand.u32 4294901760, %v1555_v35 }
 0x25d   :  { %1469 = vmatmul.f32.gmra.mxu0 %v4213_v44  ;;  %2961 = vmatmul.msk.f32.gmra.mxu1 %vm1362_vm6, %v5243_v53 }
 0x25e   :  { %1860 = vmatmul.f32.gmra.mxu3 %v4200_v48 }
 0x25f   :  { %1738 = vmatmul.f32.gmra.mxu2 %v4195_v9 }
 0x265   :  { %1477 = vmatmul.f32.gmra.mxu0 %v4229_v36  ;;  %2962 = vmatmul.msk.f32.gmra.mxu1 %vm1362_vm6, %v5244_v32 }
 0x266   :  { %1866 = vmatmul.f32.gmra.mxu3 %v4216_v34 }
 0x267   :  { %1743 = vmatmul.f32.gmra.mxu2 %v4211_v8 }
 0x26d   :  { %1485 = vmatmul.f32.gmra.mxu0 %v4245_v43  ;;  %2963 = vmatmul.msk.f32.gmra.mxu1 %vm1362_vm6, %v5246_v59 }
 0x26e   :  { %1872 = vmatmul.f32.gmra.mxu3 %v4232_v22  ;;  %v5289_v22 = vld [vmem:[#allocation12_spill] sm:$0xff] }
 0x26f   :  { %1748 = vmatmul.f32.gmra.mxu2 %v4227_v31 }
 0x275   :  { %1493 = vmatmul.f32.gmra.mxu0 %v4261_v38  ;;  %2964 = vmatmul.msk.f32.gmra.mxu1 %vm1362_vm6, %v5248_v0 }
 0x276   :  { %1878 = vmatmul.f32.gmra.mxu3 %v4248_v50 }
 0x277   :  { %1753 = vmatmul.f32.gmra.mxu2 %v4243_v2 }
 0x27d   :  { %1501 = vmatmul.f32.gmra.mxu0 %v4277_v20  ;;  %2965 = vmatmul.msk.f32.gmra.mxu1 %vm1362_vm6, %v5251_v3 }
 0x27e   :  { %1884 = vmatmul.f32.gmra.mxu3 %v4264_v60 }
 0x27f   :  { %1758 = vmatmul.f32.gmra.mxu2 %v4259_v10 }
 0x285   :  { %1509 = vmatmul.f32.gmra.mxu0 %v4293_v23  ;;  %2966 = vmatmul.msk.f32.gmra.mxu1 %vm1362_vm6, %v5254_v7 }
 0x286   :  { %1890 = vmatmul.f32.gmra.mxu3 %v4280_v19 }
 0x287   :  { %1763 = vmatmul.f32.gmra.mxu2 %v4275_v12 }
 0x28d   :  { %1517 = vmatmul.f32.gmra.mxu0 %v4309_v63  ;;  %2967 = vmatmul.msk.f32.gmra.mxu1 %vm1362_vm6, %v5257_v58 }
 0x28e   :  { %1896 = vmatmul.f32.gmra.mxu3 %v4296_v11 }
 0x28f   :  { %1768 = vmatmul.f32.gmra.mxu2 %v4291_v39 }
 0x295   :  { %1525 = vmatmul.f32.gmra.mxu0 %v4325_v42  ;;  %2968 = vmatmul.msk.f32.gmra.mxu1 %vm1362_vm6, %v5260_v24 }
 0x296   :  { %1902 = vmatmul.f32.gmra.mxu3 %v4312_v25  ;;  %v5283_v25 = vld [vmem:[#allocation8_spill] sm:$0xff] }
 0x297   :  { %1773 = vmatmul.f32.gmra.mxu2 %v4307_v61  ;;  %v5286_v61 = vld [vmem:[#allocation9_spill] sm:$0xff] }
 0x298   :  { %v1418_v19 = vsel %vm1362_vm6, %v5286_v61, 0 }
 0x29d   :  { %1533 = vmatmul.f32.gmra.mxu0 %v4341_v4  ;;  %2969 = vmatmul.msk.f32.gmra.mxu1 %vm1362_vm6, %v5263_v41 }
 0x29e   :  { %1908 = vmatmul.f32.gmra.mxu3 %v4328_v1  ;;  %v5280_v1 = vld [vmem:[#allocation6_spill] sm:$0xff] }
 0x29f   :  { %1778 = vmatmul.f32.gmra.mxu2 %v4323_v52  ;;  %v1415_v52 = vsel %vm1362_vm6, %v5283_v25, 0 }
 0x2a5   :  { %1541 = vmatmul.f32.gmra.mxu0 %v4357_v49  ;;  %2970 = vmatmul.msk.f32.gmra.mxu1 %vm1362_vm6, %v5266_v54 }
 0x2a6   :  { %1914 = vmatmul.f32.gmra.mxu3 %v4344_v46  ;;  %v4392_v46 = vand.u32 4294901760, %v4387_v37 }
 0x2a7   :  { %1783 = vmatmul.f32.gmra.mxu2 %v4339_v51  ;;  %v1412_v51 = vsel %vm1362_vm6, %v5280_v1, 0 }
 0x2a8   :  { %5279 = vst [vmem:[#allocation29_spill] sm:$0xff] %v4392_v46  ;;  %v1563_v40 = vsub.f32 %v4387_v37, %v4392_v46  ;;  %v4403_v35 = vsub.f32 %v1412_v51, %v1412_v51 }
 0x2aa   :  { %5281 = vst [vmem:[#allocation6_spill] sm:$0xff] %v4403_v35 }
 0x2ad   :  { %1549 = vmatmul.f32.gmra.mxu0 %v4373_v16  ;;  %2971 = vmatmul.msk.f32.gmra.mxu1 %vm1362_vm6, %v3628_v33 }
 0x2ae   :  { %1920 = vmatmul.f32.gmra.mxu3 %v4360_v57  ;;  %v4405_v57 = vand.u32 4294901760, %v1563_v40  ;;  %v4419_v40 = vsub.f32 %v1415_v52, %v1415_v52 }
 0x2af   :  { %1788 = vmatmul.f32.gmra.mxu2 %v4355_v45  ;;  %v4408_v45 = vand.u32 4294901760, %v4403_v35 }
 0x2b0   :  { %5284 = vst [vmem:[#allocation8_spill] sm:$0xff] %v4419_v40  ;;  %v4424_v11 = vand.u32 4294901760, %v4419_v40 }
 0x2b1   :  { %5282 = vst [vmem:[#allocation30_spill] sm:$0xff] %v4408_v45  ;;  %v1571_v51 = vsub.f32 %v4403_v35, %v4408_v45 }
 0x2b2   :  { %5285 = vst [vmem:[#allocation31_spill] sm:$0xff] %v4424_v11  ;;  %v1579_v52 = vsub.f32 %v4419_v40, %v4424_v11 }
 0x2b4   :  { %v4437_v50 = vand.u32 4294901760, %v1579_v52 }
 0x2b5   :  { %1557 = vmatmul.f32.gmra.mxu0 %v4389_v14  ;;  %2972 = vmatmul.msk.f32.gmra.mxu1 %vm1362_vm6, %v5271_v62 }
 0x2b6   :  { %1926 = vmatmul.f32.gmra.mxu3 %v4376_v18 }
 0x2b7   :  { %1793 = vmatmul.f32.gmra.mxu2 %v4371_v28  ;;  %v4421_v28 = vand.u32 4294901760, %v1571_v51  ;;  %v4435_v51 = vsub.f32 %v1418_v19, %v1418_v19 }
 0x2b9   :  { %5287 = vst [vmem:[#allocation9_spill] sm:$0xff] %v4435_v51  ;;  %v4440_v10 = vand.u32 4294901760, %v4435_v51 }
 0x2bb   :  { %5288 = vst [vmem:[#allocation32_spill] sm:$0xff] %v4440_v10  ;;  %v1587_v19 = vsub.f32 %v4435_v51, %v4440_v10 }
 0x2bd   :  { %1565 = vmatmul.f32.gmra.mxu0 %v4405_v57  ;;  %2973 = vmatmul.msk.f32.gmra.mxu1 %vm1362_vm6, %v5274_v55  ;;  %v4455_v31 = vand.u32 4294901760, %v1587_v19 }
 0x2be   :  { %1932 = vmatmul.f32.gmra.mxu3 %v4392_v46 }
 0x2bf   :  { %1798 = vmatmul.f32.gmra.mxu2 %v4387_v37 }
 0x2c2   :  { %v1446_v18 = vpop.f32.mrf.mxu0 }
 0x2c5   :  { %1573 = vmatmul.f32.gmra.mxu0 %v4421_v28  ;;  %2974 = vmatmul.msk.f32.gmra.mxu1 %vm1362_vm6, %v5277_v47 }
 0x2c6   :  { %1938 = vmatmul.f32.gmra.mxu3 %v4408_v45  ;;  %v1421_v45 = vsel %vm1362_vm6, %v5289_v22, 0 }
 0x2c7   :  { %1803 = vmatmul.f32.gmra.mxu2 %v4403_v35 }
 0x2c8   :  { %v1843_v46 = vpop.f32.mrf.mxu3 }
 0x2ca   :  { %v1454_v37 = vpop.f32.mrf.mxu0  ;;  %v1624_v39 = vpop.f32.mrf.mxu1 }
 0x2cb   :  { %v1625_v60 = vadd.f32 %v1624_v39, %v1446_v18  ;;  %v1724_v12 = vpop.f32.mrf.mxu2  ;;  %v4451_v39 = vsub.f32 %v1421_v45, %v1421_v45 }
 0x2cd   :  { %v1725_v2 = vadd.f32 %v1724_v12, %v1625_v60  ;;  %1581 = vmatmul.f32.gmra.mxu0 %v4437_v50  ;;  %2975 = vmatmul.msk.f32.gmra.mxu1 %vm1362_vm6, %v5280_v1  ;;  %v4458_v48 = vand.u32 4294901760, %v4451_v39 }
 0x2ce   :  { %1944 = vmatmul.f32.gmra.mxu3 %v4424_v11 }
 0x2cf   :  { %1808 = vmatmul.f32.gmra.mxu2 %v4419_v40  ;;  %v4453_v18 = vadd.f32 %v1843_v46, %v1725_v2  ;;  %v1595_v2 = vsub.f32 %v4451_v39, %v4458_v48 }
 0x2d1   :  { %v1849_v52 = vpop.f32.mrf.mxu3 }
 0x2d2   :  { %v1462_v35 = vpop.f32.mrf.mxu0  ;;  %v1628_v34 = vpop.f32.mrf.mxu1 }
 0x2d3   :  { %v1629_v60 = vadd.f32 %v1628_v34, %v1454_v37  ;;  %v1729_v12 = vpop.f32.mrf.mxu2 }
 0x2d5   :  { %v1730_v11 = vadd.f32 %v1729_v12, %v1629_v60  ;;  %1589 = vmatmul.f32.gmra.mxu0 %v4455_v31  ;;  %2976 = vmatmul.msk.f32.gmra.mxu1 %vm1362_vm6, %v5283_v25  ;;  %v4469_v60 = vand.u32 4294901760, %v1595_v2 }
 0x2d6   :  { %1950 = vmatmul.f32.gmra.mxu3 %v4440_v10 }
 0x2d7   :  { %1813 = vmatmul.f32.gmra.mxu2 %v4435_v51  ;;  %v4467_v34 = vadd.f32 %v1849_v52, %v1730_v11 }
 0x2d9   :  { %5290 = vst [vmem:[#allocation12_spill] sm:$0xff] %v4467_v34  ;;  %v1855_v46 = vpop.f32.mrf.mxu3 }
 0x2da   :  { %v1470_v45 = vpop.f32.mrf.mxu0  ;;  %v1632_v37 = vpop.f32.mrf.mxu1 }
 0x2db   :  { %v1633_v19 = vadd.f32 %v1632_v37, %v1462_v35  ;;  %v1734_v40 = vpop.f32.mrf.mxu2 }
 0x2dd   :  { %v1735_v12 = vadd.f32 %v1734_v40, %v1633_v19  ;;  %1597 = vmatmul.f32.gmra.mxu0 %v4469_v60  ;;  %2977 = vmatmul.msk.f32.gmra.mxu1 %vm1362_vm6, %v5286_v61 }
 0x2de   :  { %1956 = vmatmul.f32.gmra.mxu3 %v4458_v48 }
 0x2df   :  { %1818 = vmatmul.f32.gmra.mxu2 %v4451_v39  ;;  %v4476_v10 = vadd.f32 %v1855_v46, %v1735_v12 }
 0x2e1   :  { %v1861_v11 = vpop.f32.mrf.mxu3 }
 0x2e2   :  { %v1478_v52 = vpop.f32.mrf.mxu0  ;;  %v1636_v51 = vpop.f32.mrf.mxu1 }
 0x2e3   :  { %v1637_v34 = vadd.f32 %v1636_v51, %v1470_v45  ;;  %v1739_v35 = vpop.f32.mrf.mxu2 }
 0x2e5   :  { %v1740_v37 = vadd.f32 %v1739_v35, %v1637_v34  ;;  %2978 = vmatmul.msk.f32.gmra.mxu1 %vm1362_vm6, %v5289_v22  ;;  %2979 = vmatmul.msk.f32.vlgmr.msrb.gmra.mxu0 %vm1362_vm6, %v3221_v29 }
 0x2e6   :  { %3019 = vmatmul.msk.f32.vlgmr.msrb.gmra.mxu3 %vm1362_vm6, %v3221_v29 }
 0x2e7   :  { %2180 = vmatmul.f32.vlgmr.msrb.gmra.mxu2 %v4167_v27  ;;  %v4485_v40 = vadd.f32 %v1861_v11, %v1740_v37 }
 0x2e9   :  { %v1867_v2 = vpop.f32.mrf.mxu3 }
 0x2ea   :  { %v1486_v46 = vpop.f32.mrf.mxu0  ;;  %v1640_v19 = vpop.f32.mrf.mxu1 }
 0x2eb   :  { %v1641_v12 = vadd.f32 %v1640_v19, %v1478_v52  ;;  %v1744_v51 = vpop.f32.mrf.mxu2 }
 0x2ed   :  { %v1745_v45 = vadd.f32 %v1744_v51, %v1641_v12  ;;  %2980 = vmatmul.msk.f32.gmra.mxu0 %vm1362_vm6, %v5242_v6  ;;  %2999 = vmatmul.msk.f32.vlgmr.msrb.gmra.mxu1 %vm1362_vm6, %v3221_v29 }
 0x2ee   :  { %3020 = vmatmul.msk.f32.gmra.mxu3 %vm1362_vm6, %v5242_v6 }
 0x2ef   :  { %2188 = vmatmul.f32.gmra.mxu2 %v4181_v5  ;;  %v4494_v27 = vadd.f32 %v1867_v2, %v1745_v45 }
 0x2f1   :  { %v1873_v34 = vpop.f32.mrf.mxu3 }
 0x2f2   :  { %v1494_v11 = vpop.f32.mrf.mxu0  ;;  %v1644_v35 = vpop.f32.mrf.mxu1 }
 0x2f3   :  { %v1645_v37 = vadd.f32 %v1644_v35, %v1486_v46  ;;  %v1749_v52 = vpop.f32.mrf.mxu2 }
 0x2f5   :  { %v1750_v19 = vadd.f32 %v1749_v52, %v1645_v37  ;;  %2981 = vmatmul.msk.f32.gmra.mxu0 %vm1362_vm6, %v5243_v53  ;;  %3000 = vmatmul.msk.f32.gmra.mxu1 %vm1362_vm6, %v5242_v6 }
 0x2f6   :  { %3021 = vmatmul.msk.f32.gmra.mxu3 %vm1362_vm6, %v5243_v53 }
 0x2f7   :  { %2196 = vmatmul.f32.gmra.mxu2 %v4197_v15  ;;  %v4503_v5 = vadd.f32 %v1873_v34, %v1750_v19 }
 0x2f9   :  { %v1879_v2 = vpop.f32.mrf.mxu3 }
 0x2fa   :  { %v1502_v12 = vpop.f32.mrf.mxu0  ;;  %v1648_v51 = vpop.f32.mrf.mxu1 }
 0x2fb   :  { %v1649_v45 = vadd.f32 %v1648_v51, %v1494_v11  ;;  %v1754_v46 = vpop.f32.mrf.mxu2 }
 0x2fd   :  { %v1755_v35 = vadd.f32 %v1754_v46, %v1649_v45  ;;  %2982 = vmatmul.msk.f32.gmra.mxu0 %vm1362_vm6, %v5244_v32  ;;  %3001 = vmatmul.msk.f32.gmra.mxu1 %vm1362_vm6, %v5243_v53 }
 0x2fe   :  { %3022 = vmatmul.msk.f32.gmra.mxu3 %vm1362_vm6, %v5244_v32 }
 0x2ff   :  { %2204 = vmatmul.f32.gmra.mxu2 %v4213_v44  ;;  %v4512_v15 = vadd.f32 %v1879_v2, %v1755_v35 }
 0x301   :  { %v1885_v34 = vpop.f32.mrf.mxu3 }
 0x302   :  { %v1510_v37 = vpop.f32.mrf.mxu0  ;;  %v1652_v52 = vpop.f32.mrf.mxu1 }
 0x303   :  { %v1653_v19 = vadd.f32 %v1652_v52, %v1502_v12  ;;  %v1759_v11 = vpop.f32.mrf.mxu2 }
 0x305   :  { %v1760_v51 = vadd.f32 %v1759_v11, %v1653_v19  ;;  %2983 = vmatmul.msk.f32.gmra.mxu0 %vm1362_vm6, %v5246_v59  ;;  %3002 = vmatmul.msk.f32.gmra.mxu1 %vm1362_vm6, %v5244_v32 }
 0x306   :  { %3023 = vmatmul.msk.f32.gmra.mxu3 %vm1362_vm6, %v5246_v59 }
 0x307   :  { %2212 = vmatmul.f32.gmra.mxu2 %v4229_v36  ;;  %v4521_v44 = vadd.f32 %v1885_v34, %v1760_v51 }
 0x309   :  { %v1891_v2 = vpop.f32.mrf.mxu3 }
 0x30a   :  { %v1518_v45 = vpop.f32.mrf.mxu0  ;;  %v1656_v46 = vpop.f32.mrf.mxu1 }
 0x30b   :  { %v1657_v35 = vadd.f32 %v1656_v46, %v1510_v37  ;;  %v1764_v12 = vpop.f32.mrf.mxu2 }
 0x30d   :  { %v1765_v52 = vadd.f32 %v1764_v12, %v1657_v35  ;;  %2984 = vmatmul.msk.f32.gmra.mxu0 %vm1362_vm6, %v5248_v0  ;;  %3003 = vmatmul.msk.f32.gmra.mxu1 %vm1362_vm6, %v5246_v59 }
 0x30e   :  { %3024 = vmatmul.msk.f32.gmra.mxu3 %vm1362_vm6, %v5248_v0 }
 0x30f   :  { %2220 = vmatmul.f32.gmra.mxu2 %v4245_v43  ;;  %v4530_v36 = vadd.f32 %v1891_v2, %v1765_v52 }
 0x311   :  { %v1897_v34 = vpop.f32.mrf.mxu3 }
 0x312   :  { %v1526_v19 = vpop.f32.mrf.mxu0  ;;  %v1660_v11 = vpop.f32.mrf.mxu1 }
 0x313   :  { %v1661_v51 = vadd.f32 %v1660_v11, %v1518_v45  ;;  %v1769_v37 = vpop.f32.mrf.mxu2 }
 0x315   :  { %v1770_v46 = vadd.f32 %v1769_v37, %v1661_v51  ;;  %2985 = vmatmul.msk.f32.gmra.mxu0 %vm1362_vm6, %v5251_v3  ;;  %3004 = vmatmul.msk.f32.gmra.mxu1 %vm1362_vm6, %v5248_v0 }
 0x316   :  { %3025 = vmatmul.msk.f32.gmra.mxu3 %vm1362_vm6, %v5251_v3 }
 0x317   :  { %2228 = vmatmul.f32.gmra.mxu2 %v4261_v38  ;;  %v4539_v43 = vadd.f32 %v1897_v34, %v1770_v46 }
 0x319   :  { %5291 = vst [vmem:[#allocation33_spill] sm:$0xff] %v4539_v43  ;;  %v1903_v2 = vpop.f32.mrf.mxu3 }
 0x31a   :  { %v1534_v35 = vpop.f32.mrf.mxu0  ;;  %v1664_v12 = vpop.f32.mrf.mxu1 }
 0x31b   :  { %v1665_v52 = vadd.f32 %v1664_v12, %v1526_v19  ;;  %v1774_v45 = vpop.f32.mrf.mxu2 }
 0x31d   :  { %v1775_v11 = vadd.f32 %v1774_v45, %v1665_v52  ;;  %2986 = vmatmul.msk.f32.gmra.mxu0 %vm1362_vm6, %v5254_v7  ;;  %3005 = vmatmul.msk.f32.gmra.mxu1 %vm1362_vm6, %v5251_v3 }
 0x31e   :  { %3026 = vmatmul.msk.f32.gmra.mxu3 %vm1362_vm6, %v5254_v7 }
 0x31f   :  { %2236 = vmatmul.f32.gmra.mxu2 %v4277_v20  ;;  %v4548_v38 = vadd.f32 %v1903_v2, %v1775_v11 }
 0x321   :  { %5292 = vst [vmem:[#allocation34_spill] sm:$0xff] %v4548_v38  ;;  %v1909_v34 = vpop.f32.mrf.mxu3 }
 0x322   :  { %v1542_v51 = vpop.f32.mrf.mxu0  ;;  %v1668_v37 = vpop.f32.mrf.mxu1 }
 0x323   :  { %v1669_v46 = vadd.f32 %v1668_v37, %v1534_v35  ;;  %v1779_v19 = vpop.f32.mrf.mxu2 }
 0x325   :  { %v1780_v12 = vadd.f32 %v1779_v19, %v1669_v46  ;;  %2987 = vmatmul.msk.f32.gmra.mxu0 %vm1362_vm6, %v5257_v58  ;;  %3006 = vmatmul.msk.f32.gmra.mxu1 %vm1362_vm6, %v5254_v7 }
 0x326   :  { %3027 = vmatmul.msk.f32.gmra.mxu3 %vm1362_vm6, %v5257_v58 }
 0x327   :  { %2244 = vmatmul.f32.gmra.mxu2 %v4293_v23  ;;  %v4557_v20 = vadd.f32 %v1909_v34, %v1780_v12 }
 0x329   :  { %5293 = vst [vmem:[#allocation35_spill] sm:$0xff] %v4557_v20  ;;  %v1915_v2 = vpop.f32.mrf.mxu3 }
 0x32a   :  { %v1550_v52 = vpop.f32.mrf.mxu0  ;;  %v1672_v45 = vpop.f32.mrf.mxu1 }
 0x32b   :  { %v1673_v11 = vadd.f32 %v1672_v45, %v1542_v51  ;;  %v1784_v35 = vpop.f32.mrf.mxu2 }
 0x32d   :  { %v1785_v37 = vadd.f32 %v1784_v35, %v1673_v11  ;;  %2988 = vmatmul.msk.f32.gmra.mxu0 %vm1362_vm6, %v5260_v24  ;;  %3007 = vmatmul.msk.f32.gmra.mxu1 %vm1362_vm6, %v5257_v58 }
 0x32e   :  { %3028 = vmatmul.msk.f32.gmra.mxu3 %vm1362_vm6, %v5260_v24 }
 0x32f   :  { %2252 = vmatmul.f32.gmra.mxu2 %v4309_v63  ;;  %v4566_v23 = vadd.f32 %v1915_v2, %v1785_v37 }
 0x331   :  { %5294 = vst [vmem:[#allocation36_spill] sm:$0xff] %v4566_v23  ;;  %v1921_v34 = vpop.f32.mrf.mxu3 }
 0x332   :  { %v1558_v46 = vpop.f32.mrf.mxu0  ;;  %v1676_v19 = vpop.f32.mrf.mxu1 }
 0x333   :  { %v1677_v12 = vadd.f32 %v1676_v19, %v1550_v52  ;;  %v1789_v51 = vpop.f32.mrf.mxu2 }
 0x335   :  { %v1790_v45 = vadd.f32 %v1789_v51, %v1677_v12  ;;  %2989 = vmatmul.msk.f32.gmra.mxu0 %vm1362_vm6, %v5263_v41  ;;  %3008 = vmatmul.msk.f32.gmra.mxu1 %vm1362_vm6, %v5260_v24 }
 0x336   :  { %3029 = vmatmul.msk.f32.gmra.mxu3 %vm1362_vm6, %v5263_v41 }
 0x337   :  { %2260 = vmatmul.f32.gmra.mxu2 %v4325_v42  ;;  %v4575_v63 = vadd.f32 %v1921_v34, %v1790_v45 }
 0x339   :  { %5295 = vst [vmem:[#allocation37_spill] sm:$0xff] %v4575_v63  ;;  %v1927_v2 = vpop.f32.mrf.mxu3 }
 0x33a   :  { %v1566_v11 = vpop.f32.mrf.mxu0  ;;  %v1680_v35 = vpop.f32.mrf.mxu1 }
 0x33b   :  { %v1681_v37 = vadd.f32 %v1680_v35, %v1558_v46  ;;  %v1794_v52 = vpop.f32.mrf.mxu2 }
 0x33d   :  { %v1795_v19 = vadd.f32 %v1794_v52, %v1681_v37  ;;  %2990 = vmatmul.msk.f32.gmra.mxu0 %vm1362_vm6, %v5266_v54  ;;  %3009 = vmatmul.msk.f32.gmra.mxu1 %vm1362_vm6, %v5263_v41 }
 0x33e   :  { %3030 = vmatmul.msk.f32.gmra.mxu3 %vm1362_vm6, %v5266_v54 }
 0x33f   :  { %2268 = vmatmul.f32.gmra.mxu2 %v4341_v4  ;;  %v4584_v42 = vadd.f32 %v1927_v2, %v1795_v19 }
 0x341   :  { %5296 = vst [vmem:[#allocation38_spill] sm:$0xff] %v4584_v42  ;;  %v1933_v34 = vpop.f32.mrf.mxu3 }
 0x342   :  { %v1574_v12 = vpop.f32.mrf.mxu0  ;;  %v1684_v51 = vpop.f32.mrf.mxu1 }
 0x343   :  { %v1685_v45 = vadd.f32 %v1684_v51, %v1566_v11  ;;  %v1799_v46 = vpop.f32.mrf.mxu2 }
 0x345   :  { %v1800_v35 = vadd.f32 %v1799_v46, %v1685_v45  ;;  %2991 = vmatmul.msk.f32.gmra.mxu0 %vm1362_vm6, %v3628_v33  ;;  %3010 = vmatmul.msk.f32.gmra.mxu1 %vm1362_vm6, %v5266_v54 }
 0x346   :  { %3031 = vmatmul.msk.f32.gmra.mxu3 %vm1362_vm6, %v3628_v33 }
 0x347   :  { %2276 = vmatmul.f32.gmra.mxu2 %v4357_v49  ;;  %v4593_v4 = vadd.f32 %v1933_v34, %v1800_v35 }
 0x349   :  { %5297 = vst [vmem:[#allocation39_spill] sm:$0xff] %v4593_v4  ;;  %v1939_v2 = vpop.f32.mrf.mxu3 }
 0x34a   :  { %v1582_v37 = vpop.f32.mrf.mxu0  ;;  %v1688_v52 = vpop.f32.mrf.mxu1 }
 0x34b   :  { %v1689_v19 = vadd.f32 %v1688_v52, %v1574_v12  ;;  %v1804_v11 = vpop.f32.mrf.mxu2 }
 0x34d   :  { %v1805_v51 = vadd.f32 %v1804_v11, %v1689_v19  ;;  %2992 = vmatmul.msk.f32.gmra.mxu0 %vm1362_vm6, %v5271_v62  ;;  %3011 = vmatmul.msk.f32.gmra.mxu1 %vm1362_vm6, %v3628_v33 }
 0x34e   :  { %3032 = vmatmul.msk.f32.gmra.mxu3 %vm1362_vm6, %v5271_v62 }
 0x34f   :  { %2284 = vmatmul.f32.gmra.mxu2 %v4373_v16  ;;  %v4602_v49 = vadd.f32 %v1939_v2, %v1805_v51 }
 0x351   :  { %v1945_v34 = vpop.f32.mrf.mxu3 }
 0x352   :  { %v1590_v45 = vpop.f32.mrf.mxu0  ;;  %v1692_v46 = vpop.f32.mrf.mxu1 }
 0x353   :  { %v1693_v35 = vadd.f32 %v1692_v46, %v1582_v37  ;;  %v1809_v12 = vpop.f32.mrf.mxu2 }
 0x355   :  { %v1810_v52 = vadd.f32 %v1809_v12, %v1693_v35  ;;  %2993 = vmatmul.msk.f32.gmra.mxu0 %vm1362_vm6, %v5274_v55  ;;  %3012 = vmatmul.msk.f32.gmra.mxu1 %vm1362_vm6, %v5271_v62 }
 0x356   :  { %3033 = vmatmul.msk.f32.gmra.mxu3 %vm1362_vm6, %v5274_v55 }
 0x357   :  { %2292 = vmatmul.f32.gmra.mxu2 %v4389_v14  ;;  %v4611_v16 = vadd.f32 %v1945_v34, %v1810_v52 }
 0x359   :  { %v1951_v2 = vpop.f32.mrf.mxu3 }
 0x35a   :  { %v1598_v19 = vpop.f32.mrf.mxu0  ;;  %v1696_v11 = vpop.f32.mrf.mxu1 }
 0x35b   :  { %v1697_v51 = vadd.f32 %v1696_v11, %v1590_v45  ;;  %v1814_v37 = vpop.f32.mrf.mxu2 }
 0x35d   :  { %v1815_v46 = vadd.f32 %v1814_v37, %v1697_v51  ;;  %2994 = vmatmul.msk.f32.gmra.mxu0 %vm1362_vm6, %v5277_v47  ;;  %3013 = vmatmul.msk.f32.gmra.mxu1 %vm1362_vm6, %v5274_v55 }
 0x35e   :  { %3034 = vmatmul.msk.f32.gmra.mxu3 %vm1362_vm6, %v5277_v47 }
 0x35f   :  { %2300 = vmatmul.f32.gmra.mxu2 %v4405_v57  ;;  %v4620_v14 = vadd.f32 %v1951_v2, %v1815_v46 }
 0x361   :  { %v1957_v34 = vpop.f32.mrf.mxu3 }
 0x362   :  { %v1700_v35 = vpop.f32.mrf.mxu1  ;;  %v4622_v12 = vpop.f32.mrf.mxu0 }
 0x363   :  { %v1701_v45 = vadd.f32 %v1700_v35, %v1598_v19  ;;  %v1819_v52 = vpop.f32.mrf.mxu2 }
 0x365   :  { %v1820_v11 = vadd.f32 %v1819_v52, %v1701_v45  ;;  %2995 = vmatmul.msk.f32.gmra.mxu0 %vm1362_vm6, %v5280_v1  ;;  %3014 = vmatmul.msk.f32.gmra.mxu1 %vm1362_vm6, %v5277_v47 }
 0x366   :  { %3035 = vmatmul.msk.f32.gmra.mxu3 %vm1362_vm6, %v5280_v1 }
 0x367   :  { %2308 = vmatmul.f32.gmra.mxu2 %v4421_v28  ;;  %v4631_v57 = vadd.f32 %v1957_v34, %v1820_v11 }
 0x369   :  { %v2359_v2 = vpop.f32.mrf.mxu3 }
 0x36a   :  { %v4633_v51 = vpop.f32.mrf.mxu0  ;;  %v4635_v37 = vpop.f32.mrf.mxu1 }
 0x36b   :  { %v2181_v19 = vpop.f32.mrf.mxu2 }
 0x36c   :  { %v4637_v46 = vadd.f32 %v2359_v2, %v2181_v19 }
 0x36d   :  { %2996 = vmatmul.msk.f32.gmra.mxu0 %vm1362_vm6, %v5283_v25  ;;  %3015 = vmatmul.msk.f32.gmra.mxu1 %vm1362_vm6, %v5280_v1 }
 0x36e   :  { %3036 = vmatmul.msk.f32.gmra.mxu3 %vm1362_vm6, %v5283_v25 }
 0x36f   :  { %2316 = vmatmul.f32.gmra.mxu2 %v4437_v50 }
 0x371   :  { %v2363_v28 = vpop.f32.mrf.mxu3 }
 0x372   :  { %v4646_v34 = vpop.f32.mrf.mxu0  ;;  %v4648_v35 = vpop.f32.mrf.mxu1 }
 0x373   :  { %v2189_v45 = vpop.f32.mrf.mxu2 }
 0x374   :  { %v4650_v52 = vadd.f32 %v2363_v28, %v2189_v45 }
 0x375   :  { %2997 = vmatmul.msk.f32.gmra.mxu0 %vm1362_vm6, %v5286_v61  ;;  %3016 = vmatmul.msk.f32.gmra.mxu1 %vm1362_vm6, %v5283_v25 }
 0x376   :  { %3037 = vmatmul.msk.f32.gmra.mxu3 %vm1362_vm6, %v5286_v61 }
 0x377   :  { %2324 = vmatmul.f32.gmra.mxu2 %v4455_v31 }
 0x379   :  { %v2367_v50 = vpop.f32.mrf.mxu3 }
 0x37a   :  { %v4659_v11 = vpop.f32.mrf.mxu0  ;;  %v4661_v2 = vpop.f32.mrf.mxu1 }
 0x37b   :  { %v2197_v19 = vpop.f32.mrf.mxu2 }
 0x37c   :  { %v4663_v4 = vadd.f32 %v2367_v50, %v2197_v19 }
 0x37d   :  { %2998 = vmatmul.msk.f32.gmra.mxu0 %vm1362_vm6, %v5289_v22  ;;  %3017 = vmatmul.msk.f32.gmra.mxu1 %vm1362_vm6, %v5286_v61 }
 0x37e   :  { %3038 = vmatmul.msk.f32.gmra.mxu3 %vm1362_vm6, %v5289_v22 }
 0x37f   :  { %2332 = vmatmul.f32.gmra.mxu2 %v4469_v60 }
 0x381   :  { %v2371_v31 = vpop.f32.mrf.mxu3 }
 0x382   :  { %v4672_v28 = vpop.f32.mrf.mxu0  ;;  %v4674_v45 = vpop.f32.mrf.mxu1 }
 0x383   :  { %v2205_v42 = vpop.f32.mrf.mxu2 }
 0x384   :  { %v4676_v63 = vadd.f32 %v2371_v31, %v2205_v42 }
 0x385   :  { %3018 = vmatmul.msk.f32.gmra.mxu1 %vm1362_vm6, %v5289_v22  ;;  %2458 = vmatmul.f32.vlgmr.msra.gmra.mxu0 %v4150_v26 }
 0x386   :  { %3059 = vmatmul.msk.f32.vlgmr.msra.gmra.mxu3 %vm1362_vm6, %v3221_v29 }
 0x387   :  { %3039 = vmatmul.msk.f32.vlgmr.msra.gmra.mxu2 %vm1362_vm6, %v3221_v29 }
 0x389   :  { %v2375_v60 = vpop.f32.mrf.mxu3 }
 0x38a   :  { %v4685_v50 = vpop.f32.mrf.mxu0  ;;  %v4687_v19 = vpop.f32.mrf.mxu1 }
 0x38b   :  { %v2213_v23 = vpop.f32.mrf.mxu2 }
 0x38c   :  { %v4689_v20 = vadd.f32 %v2375_v60, %v2213_v23 }
 0x38d   :  { %2463 = vmatmul.f32.gmra.mxu0 %v4162_v30  ;;  %2577 = vmatmul.f32.vlgmr.msra.gmra.mxu1 %v4153_v21 }
 0x38e   :  { %3060 = vmatmul.msk.f32.gmra.mxu3 %vm1362_vm6, %v5242_v6 }
 0x38f   :  { %3040 = vmatmul.msk.f32.gmra.mxu2 %vm1362_vm6, %v5242_v6 }
 0x391   :  { %v2379_v26 = vpop.f32.mrf.mxu3 }
 0x392   :  { %v4697_v29 = vpop.f32.mrf.mxu0  ;;  %v4699_v42 = vpop.f32.mrf.mxu1 }
 0x393   :  { %v2221_v31 = vpop.f32.mrf.mxu2 }
 0x394   :  { %v4701_v38 = vadd.f32 %v2379_v26, %v2221_v31 }
 0x395   :  { %2468 = vmatmul.f32.gmra.mxu0 %v4179_v13  ;;  %2583 = vmatmul.f32.gmra.mxu1 %v4170_v17 }
 0x396   :  { %3061 = vmatmul.msk.f32.gmra.mxu3 %vm1362_vm6, %v5243_v53 }
 0x397   :  { %3041 = vmatmul.msk.f32.gmra.mxu2 %vm1362_vm6, %v5243_v53 }
 0x399   :  { %v2383_v21 = vpop.f32.mrf.mxu3 }
 0x39a   :  { %v4709_v6 = vpop.f32.mrf.mxu0  ;;  %v4711_v30 = vpop.f32.mrf.mxu1 }
 0x39b   :  { %v2229_v23 = vpop.f32.mrf.mxu2 }
 0x39c   :  { %v4713_v60 = vadd.f32 %v2383_v21, %v2229_v23  ;;  %v5298_v21 = vld [vmem:[#allocation2_spill] sm:$0xff] }
 0x39d   :  { %2473 = vmatmul.f32.gmra.mxu0 %v4195_v9  ;;  %2589 = vmatmul.f32.gmra.mxu1 %v4184_v56 }
 0x39e   :  { %3062 = vmatmul.msk.f32.gmra.mxu3 %vm1362_vm6, %v5244_v32 }
 0x39f   :  { %3042 = vmatmul.msk.f32.gmra.mxu2 %vm1362_vm6, %v5244_v32 }
 0x3a1   :  { %v2387_v17 = vpop.f32.mrf.mxu3 }
 0x3a2   :  { %v4721_v53 = vpop.f32.mrf.mxu0  ;;  %v4723_v13 = vpop.f32.mrf.mxu1 }
 0x3a3   :  { %v2237_v26 = vpop.f32.mrf.mxu2 }
 0x3a4   :  { %v4725_v31 = vadd.f32 %v2387_v17, %v2237_v26  ;;  %v5301_v17 = vld [vmem:[#allocation4_spill] sm:$0xff]  ;;  %v5302_v26 = vld [vmem:[#allocation3_spill] sm:$0xff] }
 0x3a5   :  { %2478 = vmatmul.f32.gmra.mxu0 %v4211_v8  ;;  %2595 = vmatmul.f32.gmra.mxu1 %v5298_v21 }
 0x3a6   :  { %3063 = vmatmul.msk.f32.gmra.mxu3 %vm1362_vm6, %v5246_v59 }
 0x3a7   :  { %3043 = vmatmul.msk.f32.gmra.mxu2 %vm1362_vm6, %v5246_v59 }
 0x3a9   :  { %v2391_v56 = vpop.f32.mrf.mxu3 }
 0x3aa   :  { %v4733_v32 = vpop.f32.mrf.mxu0  ;;  %v4735_v9 = vpop.f32.mrf.mxu1 }
 0x3ab   :  { %5299 = vst [vmem:[#allocation2_spill] sm:$0xff] %v4733_v32  ;;  %v2245_v23 = vpop.f32.mrf.mxu2 }
 0x3ac   :  { %5300 = vst [vmem:[#allocation40_spill] sm:$0xff] %v4735_v9  ;;  %v4737_v43 = vadd.f32 %v2391_v56, %v2245_v23  ;;  %v5305_v56 = vld [vmem:[#allocation7_spill] sm:$0xff]  ;;  %v5306_v23 = vld [vmem:[#allocation5_spill] sm:$0xff] }
 0x3ad   :  { %2483 = vmatmul.f32.gmra.mxu0 %v5301_v17  ;;  %2601 = vmatmul.f32.gmra.mxu1 %v5302_v26 }
 0x3ae   :  { %3064 = vmatmul.msk.f32.gmra.mxu3 %vm1362_vm6, %v5248_v0 }
 0x3af   :  { %3044 = vmatmul.msk.f32.gmra.mxu2 %vm1362_vm6, %v5248_v0 }
 0x3b1   :  { %v2395_v8 = vpop.f32.mrf.mxu3 }
 0x3b2   :  { %v4745_v59 = vpop.f32.mrf.mxu0  ;;  %v4747_v21 = vpop.f32.mrf.mxu1 }
 0x3b3   :  { %5303 = vst [vmem:[#allocation4_spill] sm:$0xff] %v4745_v59  ;;  %v2253_v32 = vpop.f32.mrf.mxu2 }
 0x3b4   :  { %5304 = vst [vmem:[#allocation3_spill] sm:$0xff] %v4747_v21  ;;  %v4749_v9 = vadd.f32 %v2395_v8, %v2253_v32  ;;  %v5309_v32 = vld [vmem:[#allocation11_spill] sm:$0xff]  ;;  %v5310_v8 = vld [vmem:[#allocation10_spill] sm:$0xff] }
 0x3b5   :  { %2488 = vmatmul.f32.gmra.mxu0 %v5305_v56  ;;  %2607 = vmatmul.f32.gmra.mxu1 %v5306_v23 }
 0x3b6   :  { %3065 = vmatmul.msk.f32.gmra.mxu3 %vm1362_vm6, %v5251_v3 }
 0x3b7   :  { %3045 = vmatmul.msk.f32.gmra.mxu2 %vm1362_vm6, %v5251_v3 }
 0x3b9   :  { %v2399_v17 = vpop.f32.mrf.mxu3 }
 0x3ba   :  { %v4757_v0 = vpop.f32.mrf.mxu0  ;;  %v4759_v26 = vpop.f32.mrf.mxu1 }
 0x3bb   :  { %5307 = vst [vmem:[#allocation7_spill] sm:$0xff] %v4757_v0  ;;  %v2261_v59 = vpop.f32.mrf.mxu2 }
 0x3bc   :  { %5308 = vst [vmem:[#allocation5_spill] sm:$0xff] %v4759_v26  ;;  %v4761_v21 = vadd.f32 %v2399_v17, %v2261_v59  ;;  %v5313_v59 = vld [vmem:[#allocation13_spill] sm:$0xff]  ;;  %v5314_v17 = vld [vmem:[#allocation20_spill] sm:$0xff] }
 0x3bd   :  { %2493 = vmatmul.f32.gmra.mxu0 %v5309_v32  ;;  %2613 = vmatmul.f32.gmra.mxu1 %v5310_v8 }
 0x3be   :  { %3066 = vmatmul.msk.f32.gmra.mxu3 %vm1362_vm6, %v5254_v7 }
 0x3bf   :  { %3046 = vmatmul.msk.f32.gmra.mxu2 %vm1362_vm6, %v5254_v7 }
 0x3c1   :  { %v2403_v56 = vpop.f32.mrf.mxu3 }
 0x3c2   :  { %v4769_v3 = vpop.f32.mrf.mxu0  ;;  %v4771_v23 = vpop.f32.mrf.mxu1 }
 0x3c3   :  { %5311 = vst [vmem:[#allocation11_spill] sm:$0xff] %v4769_v3  ;;  %v2269_v0 = vpop.f32.mrf.mxu2 }
 0x3c4   :  { %5312 = vst [vmem:[#allocation10_spill] sm:$0xff] %v4771_v23  ;;  %v4773_v26 = vadd.f32 %v2403_v56, %v2269_v0  ;;  %v5317_v0 = vld [vmem:[#allocation14_spill] sm:$0xff]  ;;  %v5318_v56 = vld [vmem:[#allocation21_spill] sm:$0xff] }
 0x3c5   :  { %2498 = vmatmul.f32.gmra.mxu0 %v5313_v59  ;;  %2619 = vmatmul.f32.gmra.mxu1 %v5314_v17 }
 0x3c6   :  { %3067 = vmatmul.msk.f32.gmra.mxu3 %vm1362_vm6, %v5257_v58 }
 0x3c7   :  { %3047 = vmatmul.msk.f32.gmra.mxu2 %vm1362_vm6, %v5257_v58 }
 0x3c9   :  { %v2407_v32 = vpop.f32.mrf.mxu3 }
 0x3ca   :  { %v4781_v7 = vpop.f32.mrf.mxu0  ;;  %v4783_v8 = vpop.f32.mrf.mxu1 }
 0x3cb   :  { %5315 = vst [vmem:[#allocation13_spill] sm:$0xff] %v4781_v7  ;;  %v2277_v3 = vpop.f32.mrf.mxu2 }
 0x3cc   :  { %5316 = vst [vmem:[#allocation20_spill] sm:$0xff] %v4783_v8  ;;  %v4785_v23 = vadd.f32 %v2407_v32, %v2277_v3  ;;  %v5322_v3 = vld [vmem:[#allocation15_spill] sm:$0xff]  ;;  %v5323_v32 = vld [vmem:[#allocation22_spill] sm:$0xff] }
 0x3cd   :  { %2503 = vmatmul.f32.gmra.mxu0 %v5317_v0  ;;  %2625 = vmatmul.f32.gmra.mxu1 %v5318_v56 }
 0x3ce   :  { %3068 = vmatmul.msk.f32.gmra.mxu3 %vm1362_vm6, %v5260_v24 }
 0x3cf   :  { %3048 = vmatmul.msk.f32.gmra.mxu2 %vm1362_vm6, %v5260_v24 }
 0x3d1   :  { %v2411_v59 = vpop.f32.mrf.mxu3 }
 0x3d2   :  { %v4793_v58 = vpop.f32.mrf.mxu0  ;;  %v4795_v17 = vpop.f32.mrf.mxu1 }
 0x3d3   :  { %5319 = vst [vmem:[#allocation14_spill] sm:$0xff] %v4793_v58  ;;  %v2285_v7 = vpop.f32.mrf.mxu2 }
 0x3d4   :  { %5320 = vst [vmem:[#allocation21_spill] sm:$0xff] %v4795_v17  ;;  %v4797_v8 = vadd.f32 %v2411_v59, %v2285_v7  ;;  %v5327_v7 = vld [vmem:[#allocation16_spill] sm:$0xff]  ;;  %v5328_v59 = vld [vmem:[#allocation23_spill] sm:$0xff] }
 0x3d5   :  { %2508 = vmatmul.f32.gmra.mxu0 %v5322_v3  ;;  %2631 = vmatmul.f32.gmra.mxu1 %v5323_v32 }
 0x3d6   :  { %5321 = vst [vmem:[#allocation41_spill] sm:$0xff] %v4797_v8  ;;  %3069 = vmatmul.msk.f32.gmra.mxu3 %vm1362_vm6, %v5263_v41 }
 0x3d7   :  { %3049 = vmatmul.msk.f32.gmra.mxu2 %vm1362_vm6, %v5263_v41 }
 0x3d9   :  { %v2415_v0 = vpop.f32.mrf.mxu3 }
 0x3da   :  { %v4805_v24 = vpop.f32.mrf.mxu0  ;;  %v4807_v56 = vpop.f32.mrf.mxu1 }
 0x3db   :  { %5324 = vst [vmem:[#allocation15_spill] sm:$0xff] %v4805_v24  ;;  %v2293_v58 = vpop.f32.mrf.mxu2 }
 0x3dc   :  { %5325 = vst [vmem:[#allocation22_spill] sm:$0xff] %v4807_v56  ;;  %v4809_v17 = vadd.f32 %v2415_v0, %v2293_v58  ;;  %v5330_v58 = vld [vmem:[#allocation25_spill] sm:$0xff]  ;;  %v5331_v0 = vld [vmem:[#allocation24_spill] sm:$0xff] }
 0x3dd   :  { %2513 = vmatmul.f32.gmra.mxu0 %v5327_v7  ;;  %2637 = vmatmul.f32.gmra.mxu1 %v5328_v59 }
 0x3de   :  { %5326 = vst [vmem:[#allocation42_spill] sm:$0xff] %v4809_v17  ;;  %3070 = vmatmul.msk.f32.gmra.mxu3 %vm1362_vm6, %v5266_v54 }
 0x3df   :  { %3050 = vmatmul.msk.f32.gmra.mxu2 %vm1362_vm6, %v5266_v54 }
 0x3e1   :  { %v2419_v3 = vpop.f32.mrf.mxu3 }
 0x3e2   :  { %v2045_v41 = vpop.f32.mrf.mxu0  ;;  %v4817_v32 = vpop.f32.mrf.mxu1 }
 0x3e3   :  { %5329 = vst [vmem:[#allocation16_spill] sm:$0xff] %v4817_v32  ;;  %v2046_v24 = vadd.f32 %v2045_v41, %v4602_v49  ;;  %v2301_v56 = vpop.f32.mrf.mxu2  ;;  %v5333_v41 = vld [vmem:[#allocation26_spill] sm:$0xff] }
 0x3e4   :  { %v4820_v8 = vadd.f32 %v2419_v3, %v2301_v56  ;;  %v5332_v3 = vld [vmem:[#allocation17_spill] sm:$0xff] }
 0x3e5   :  { %2518 = vmatmul.f32.gmra.mxu0 %v5330_v58  ;;  %2643 = vmatmul.f32.gmra.mxu1 %v5331_v0 }
 0x3e6   :  { %3071 = vmatmul.msk.f32.gmra.mxu3 %vm1362_vm6, %v3628_v33 }
 0x3e7   :  { %3051 = vmatmul.msk.f32.gmra.mxu2 %vm1362_vm6, %v3628_v33 }
 0x3e9   :  { %v2423_v54 = vpop.f32.mrf.mxu3 }
 0x3ea   :  { %v2049_v7 = vpop.f32.mrf.mxu0  ;;  %v2143_v59 = vpop.f32.mrf.mxu1 }
 0x3eb   :  { %v2050_v32 = vadd.f32 %v2049_v7, %v4611_v16  ;;  %v4829_v17 = vadd.f32 %v2143_v59, %v2046_v24  ;;  %v2309_v49 = vpop.f32.mrf.mxu2  ;;  %v5335_v59 = vld [vmem:[#allocation18_spill] sm:$0xff] }
 0x3ec   :  { %v4831_v56 = vadd.f32 %v2423_v54, %v2309_v49  ;;  %v5336_v49 = vld [vmem:[#allocation27_spill] sm:$0xff] }
 0x3ed   :  { %2523 = vmatmul.f32.gmra.mxu0 %v5332_v3  ;;  %2649 = vmatmul.f32.gmra.mxu1 %v5333_v41 }
 0x3ee   :  { %3072 = vmatmul.msk.f32.gmra.mxu3 %vm1362_vm6, %v5271_v62 }
 0x3ef   :  { %3052 = vmatmul.msk.f32.gmra.mxu2 %vm1362_vm6, %v5271_v62 }
 0x3f1   :  { %v2427_v33 = vpop.f32.mrf.mxu3 }
 0x3f2   :  { %v2053_v58 = vpop.f32.mrf.mxu0  ;;  %v2147_v0 = vpop.f32.mrf.mxu1 }
 0x3f3   :  { %v2054_v16 = vadd.f32 %v2053_v58, %v4620_v14  ;;  %v4840_v24 = vadd.f32 %v2147_v0, %v2050_v32  ;;  %v2317_v7 = vpop.f32.mrf.mxu2  ;;  %v5337_v0 = vld [vmem:[#allocation19_spill] sm:$0xff] }
 0x3f4   :  { %v4842_v54 = vadd.f32 %v2427_v33, %v2317_v7  ;;  %v5338_v7 = vld [vmem:[#allocation28_spill] sm:$0xff] }
 0x3f5   :  { %5334 = vst [vmem:[#allocation23_spill] sm:$0xff] %v4840_v24  ;;  %2528 = vmatmul.f32.gmra.mxu0 %v5335_v59  ;;  %2655 = vmatmul.f32.gmra.mxu1 %v5336_v49 }
 0x3f6   :  { %3073 = vmatmul.msk.f32.gmra.mxu3 %vm1362_vm6, %v5274_v55 }
 0x3f7   :  { %3053 = vmatmul.msk.f32.gmra.mxu2 %vm1362_vm6, %v5274_v55 }
 0x3f9   :  { %v2431_v62 = vpop.f32.mrf.mxu3 }
 0x3fa   :  { %v2057_v3 = vpop.f32.mrf.mxu0  ;;  %v2151_v41 = vpop.f32.mrf.mxu1 }
 0x3fb   :  { %v2058_v14 = vadd.f32 %v2057_v3, %v4631_v57  ;;  %v4851_v32 = vadd.f32 %v2151_v41, %v2054_v16  ;;  %v2325_v58 = vpop.f32.mrf.mxu2  ;;  %v5340_v3 = vld [vmem:[#allocation29_spill] sm:$0xff] }
 0x3fc   :  { %v4853_v33 = vadd.f32 %v2431_v62, %v2325_v58  ;;  %v5339_v62 = vld [vmem:[#allocation6_spill] sm:$0xff] }
 0x3fd   :  { %2533 = vmatmul.f32.gmra.mxu0 %v5337_v0  ;;  %2661 = vmatmul.f32.gmra.mxu1 %v5338_v7 }
 0x3fe   :  { %3074 = vmatmul.msk.f32.gmra.mxu3 %vm1362_vm6, %v5277_v47 }
 0x3ff   :  { %3054 = vmatmul.msk.f32.gmra.mxu2 %vm1362_vm6, %v5277_v47  ;;  %v1982_v47 = vadd.f32 %v4622_v12, %v4453_v18 }
 0x401   :  { %v2435_v55 = vpop.f32.mrf.mxu3  ;;  %v2080_v7 = vadd.f32 %v4635_v37, %v1982_v47  ;;  %v5343_v37 = vld [vmem:[#allocation12_spill] sm:$0xff] }
 0x402   :  { %v2155_v59 = vpop.f32.mrf.mxu1  ;;  %v2459_v49 = vpop.f32.mrf.mxu0 }
 0x403   :  { %v4861_v24 = vadd.f32 %v2155_v59, %v2058_v14  ;;  %v2333_v57 = vpop.f32.mrf.mxu2  ;;  %v2460_v41 = vadd.f32 %v2459_v49, %v4637_v46  ;;  %v1986_v46 = vadd.f32 %v4633_v51, %v5343_v37  ;;  %v3090_v51 = vld [vmem:[%s5104_s0 + $0x8] sm:$0xff] }
 0x404   :  { %v4863_v16 = vadd.f32 %v2435_v55, %v2333_v57 }
 0x405   :  { %2538 = vmatmul.f32.gmra.mxu0 %v5339_v62  ;;  %2667 = vmatmul.f32.gmra.mxu1 %v5340_v3  ;;  %v5341_v62 = vld [vmem:[#allocation8_spill] sm:$0xff]  ;;  %v5342_v3 = vld [vmem:[#allocation30_spill] sm:$0xff] }
 0x406   :  { %3075 = vmatmul.msk.f32.gmra.mxu3 %vm1362_vm6, %v5280_v1 }
 0x407   :  { %3055 = vmatmul.msk.f32.gmra.mxu2 %vm1362_vm6, %v5280_v1  ;;  %v3089_v1 = vld [vmem:[%s5104_s0] sm:$0xff] }
 0x408   :  { %v2893_v18 = vmul.f32 %v3089_v1, %v2080_v7 }
 0x409   :  { %v2814_v14 = vpop.f32.mrf.mxu3 }
 0x40a   :  { %v2464_v58 = vpop.f32.mrf.mxu0  ;;  %v2578_v0 = vpop.f32.mrf.mxu1 }
 0x40b   :  { %v2579_v55 = vadd.f32 %v2578_v0, %v2460_v41  ;;  %v2716_v59 = vpop.f32.mrf.mxu2  ;;  %v2465_v49 = vadd.f32 %v2464_v58, %v4650_v52  ;;  %v1990_v58 = vadd.f32 %v4646_v34, %v4476_v10  ;;  %v3091_v10 = vld [vmem:[%s5104_s0 + $0x10] sm:$0xff] }
 0x40d   :  { %v2717_v57 = vadd.f32 %v2716_v59, %v2579_v55  ;;  %2543 = vmatmul.f32.gmra.mxu0 %v5341_v62  ;;  %2673 = vmatmul.f32.gmra.mxu1 %v5342_v3  ;;  %v2084_v59 = vadd.f32 %v4648_v35, %v1986_v46  ;;  %v5345_v62 = vld [vmem:[#allocation31_spill] sm:$0xff]  ;;  %v2088_v46 = vadd.f32 %v4661_v2, %v1990_v58 }
 0x40e   :  { %3076 = vmatmul.msk.f32.gmra.mxu3 %vm1362_vm6, %v5283_v25  ;;  %v1994_v2 = vadd.f32 %v4659_v11, %v4485_v40  ;;  %v1998_v11 = vadd.f32 %v4672_v28, %v4494_v27  ;;  %v3093_v27 = vld [vmem:[%s5104_s0 + $0x20] sm:$0xff] }
 0x40f   :  { %v2815_v12 = vadd.f32 %v2814_v14, %v2717_v57  ;;  %3056 = vmatmul.msk.f32.gmra.mxu2 %vm1362_vm6, %v5283_v25  ;;  %v5344_v57 = vld [vmem:[#allocation9_spill] sm:$0xff]  ;;  %v2894_v35 = vmul.f32 %v3090_v51, %v2084_v59 }
 0x411   :  { %v2913_v47 = vadd.f32 %v2893_v18, %v2815_v12  ;;  %v2818_v41 = vpop.f32.mrf.mxu3 }
 0x412   :  { %v2469_v0 = vpop.f32.mrf.mxu0  ;;  %v2584_v55 = vpop.f32.mrf.mxu1 }
 0x413   :  { %2934 = vst.msk [vmem:[%s5108_s7] sm:$0xff] %vm2933_vm10, %v2913_v47  ;;  %v2585_v14 = vadd.f32 %v2584_v55, %v2465_v49  ;;  %v2720_v7 = vpop.f32.mrf.mxu2  ;;  %v2470_v3 = vadd.f32 %v2469_v0, %v4663_v4  ;;  %v2895_v4 = vmul.f32 %v3091_v10, %v2088_v46 }
 0x415   :  { %v2721_v25 = vadd.f32 %v2720_v7, %v2585_v14  ;;  %2548 = vmatmul.f32.gmra.mxu0 %v5344_v57  ;;  %2679 = vmatmul.f32.gmra.mxu1 %v5345_v62  ;;  %v2092_v7 = vadd.f32 %v4674_v45, %v1994_v2 }
 0x416   :  { %3077 = vmatmul.msk.f32.gmra.mxu3 %vm1362_vm6, %v5286_v61 }
 0x417   :  { %v2819_v52 = vadd.f32 %v2818_v41, %v2721_v25  ;;  %3057 = vmatmul.msk.f32.gmra.mxu2 %vm1362_vm6, %v5286_v61  ;;  %v5346_v61 = vld [vmem:[#allocation32_spill] sm:$0xff] }
 0x419   :  { %v2914_v1 = vadd.f32 %v2894_v35, %v2819_v52  ;;  %v2822_v18 = vpop.f32.mrf.mxu3 }
 0x41a   :  { %v2474_v12 = vpop.f32.mrf.mxu0  ;;  %v2590_v37 = vpop.f32.mrf.mxu1 }
 0x41b   :  { %2935 = vst.msk [vmem:[%s5108_s7 + $0x8] sm:$0xff] %vm2933_vm10, %v2914_v1  ;;  %v2591_v49 = vadd.f32 %v2590_v37, %v2470_v3  ;;  %v2724_v47 = vpop.f32.mrf.mxu2  ;;  %v2475_v0 = vadd.f32 %v2474_v12, %v4676_v63  ;;  %v2096_v3 = vadd.f32 %v4687_v19, %v1998_v11  ;;  %v2002_v12 = vadd.f32 %v4685_v50, %v4503_v5  ;;  %v3094_v5 = vld [vmem:[%s5104_s0 + $0x28] sm:$0xff] }
 0x41d   :  { %v2725_v41 = vadd.f32 %v2724_v47, %v2591_v49  ;;  %2553 = vmatmul.f32.gmra.mxu0 %v4451_v39  ;;  %2685 = vmatmul.f32.gmra.mxu1 %v5346_v61  ;;  %v2897_v28 = vmul.f32 %v3093_v27, %v2096_v3 }
 0x41e   :  { %3078 = vmatmul.msk.f32.gmra.mxu3 %vm1362_vm6, %v5289_v22 }
 0x41f   :  { %v2823_v34 = vadd.f32 %v2822_v18, %v2725_v41  ;;  %3058 = vmatmul.msk.f32.gmra.mxu2 %vm1362_vm6, %v5289_v22  ;;  %v3092_v22 = vld [vmem:[%s5104_s0 + $0x18] sm:$0xff]  ;;  %v2100_v41 = vadd.f32 %v4699_v42, %v2002_v12 }
 0x420   :  { %v2896_v40 = vmul.f32 %v3092_v22, %v2092_v7 }
 0x421   :  { %v2915_v39 = vadd.f32 %v2895_v4, %v2823_v34  ;;  %v2826_v55 = vpop.f32.mrf.mxu3  ;;  %v2898_v50 = vmul.f32 %v3094_v5, %v2100_v41  ;;  %v2006_v34 = vadd.f32 %v4697_v29, %v4512_v15  ;;  %v3095_v15 = vld [vmem:[%s5104_s0 + $0x30] sm:$0xff] }
 0x422   :  { %v2479_v59 = vpop.f32.mrf.mxu0  ;;  %v2596_v14 = vpop.f32.mrf.mxu1 }
 0x423   :  { %2936 = vst.msk [vmem:[%s5108_s7 + $0x10] sm:$0xff] %vm2933_vm10, %v2915_v39  ;;  %v2597_v25 = vadd.f32 %v2596_v14, %v2475_v0  ;;  %v2728_v57 = vpop.f32.mrf.mxu2  ;;  %v2480_v45 = vadd.f32 %v2479_v59, %v4689_v20  ;;  %v2104_v59 = vadd.f32 %v4711_v30, %v2006_v34 }
 0x425   :  { %v2729_v62 = vadd.f32 %v2728_v57, %v2597_v25  ;;  %2691 = vmatmul.f32.gmra.mxu1 %v4458_v48  ;;  %v2899_v29 = vmul.f32 %v3095_v15, %v2104_v59  ;;  %v2010_v57 = vadd.f32 %v4709_v6, %v4521_v44  ;;  %v3096_v44 = vld [vmem:[%s5104_s0 + $0x38] sm:$0xff] }
 0x427   :  { %v2827_v63 = vadd.f32 %v2826_v55, %v2729_v62  ;;  %v2108_v11 = vadd.f32 %v4723_v13, %v2010_v57 }
 0x429   :  { %v2916_v51 = vadd.f32 %v2896_v40, %v2827_v63  ;;  %v2830_v35 = vpop.f32.mrf.mxu3  ;;  %v2900_v6 = vmul.f32 %v3096_v44, %v2108_v11  ;;  %v5355_v11 = vld [vmem:[#allocation7_spill] sm:$0xff] }
 0x42a   :  { %v2484_v52 = vpop.f32.mrf.mxu0  ;;  %v2602_v58 = vpop.f32.mrf.mxu1 }
 0x42b   :  { %2937 = vst.msk [vmem:[%s5108_s7 + $0x18] sm:$0xff] %vm2933_vm10, %v2916_v51  ;;  %v2603_v48 = vadd.f32 %v2602_v58, %v2480_v45  ;;  %v2732_v1 = vpop.f32.mrf.mxu2  ;;  %v2485_v37 = vadd.f32 %v2484_v52, %v4701_v38  ;;  %v2014_v52 = vadd.f32 %v4721_v53, %v4530_v36  ;;  %v3097_v36 = vld [vmem:[%s5104_s0 + $0x40] sm:$0xff] }
 0x42d   :  { %v2733_v18 = vadd.f32 %v2732_v1, %v2603_v48 }
 0x42f   :  { %v2831_v20 = vadd.f32 %v2830_v35, %v2733_v18  ;;  %v5347_v18 = vld [vmem:[#allocation40_spill] sm:$0xff] }
 0x430   :  { %v2112_v27 = vadd.f32 %v5347_v18, %v2014_v52  ;;  %v5356_v52 = vld [vmem:[#allocation10_spill] sm:$0xff] }
 0x431   :  { %v2917_v19 = vadd.f32 %v2897_v28, %v2831_v20  ;;  %v2834_v46 = vpop.f32.mrf.mxu3 }
 0x432   :  { %v2489_v49 = vpop.f32.mrf.mxu0  ;;  %v2608_v47 = vpop.f32.mrf.mxu1  ;;  %v2901_v53 = vmul.f32 %v3097_v36, %v2112_v27  ;;  %v5357_v27 = vld [vmem:[#allocation36_spill] sm:$0xff] }
 0x433   :  { %2938 = vst.msk [vmem:[%s5108_s7 + $0x20] sm:$0xff] %vm2933_vm10, %v2917_v19  ;;  %v2609_v61 = vadd.f32 %v2608_v47, %v2485_v37  ;;  %v2736_v10 = vpop.f32.mrf.mxu2  ;;  %v2490_v2 = vadd.f32 %v2489_v49, %v4713_v60  ;;  %v5348_v37 = vld [vmem:[#allocation33_spill] sm:$0xff]  ;;  %v5349_v19 = vld [vmem:[#allocation2_spill] sm:$0xff] }
 0x435   :  { %v2737_v4 = vadd.f32 %v2736_v10, %v2609_v61 }
 0x437   :  { %v2835_v38 = vadd.f32 %v2834_v46, %v2737_v4  ;;  %v2018_v46 = vadd.f32 %v5349_v19, %v5348_v37  ;;  %v5350_v4 = vld [vmem:[#allocation3_spill] sm:$0xff]  ;;  %v5359_v19 = vld [vmem:[#allocation20_spill] sm:$0xff] }
 0x439   :  { %v2918_v42 = vadd.f32 %v2898_v50, %v2835_v38  ;;  %v2838_v0 = vpop.f32.mrf.mxu3  ;;  %v2116_v5 = vadd.f32 %v5350_v4, %v2018_v46  ;;  %v5360_v4 = vld [vmem:[#allocation37_spill] sm:$0xff] }
 0x43a   :  { %v2494_v39 = vpop.f32.mrf.mxu0  ;;  %v2614_v55 = vpop.f32.mrf.mxu1 }
 0x43b   :  { %2939 = vst.msk [vmem:[%s5108_s7 + $0x28] sm:$0xff] %vm2933_vm10, %v2918_v42  ;;  %v2615_v14 = vadd.f32 %v2614_v55, %v2490_v2  ;;  %v2740_v7 = vpop.f32.mrf.mxu2  ;;  %v2495_v62 = vadd.f32 %v2494_v39, %v4725_v31  ;;  %v3098_v2 = vld [vmem:[%s5104_s0 + $0x48] sm:$0xff]  ;;  %v5352_v39 = vld [vmem:[#allocation4_spill] sm:$0xff] }
 0x43c   :  { %v2902_v42 = vmul.f32 %v3098_v2, %v2116_v5  ;;  %v5361_v5 = vld [vmem:[#allocation13_spill] sm:$0xff] }
 0x43d   :  { %v2741_v25 = vadd.f32 %v2740_v7, %v2615_v14 }
 0x43f   :  { %v2839_v60 = vadd.f32 %v2838_v0, %v2741_v25  ;;  %v5351_v0 = vld [vmem:[#allocation34_spill] sm:$0xff] }
 0x440   :  { %v2022_v55 = vadd.f32 %v5352_v39, %v5351_v0  ;;  %v5363_v39 = vld [vmem:[#allocation21_spill] sm:$0xff] }
 0x441   :  { %v2919_v30 = vadd.f32 %v2899_v29, %v2839_v60  ;;  %v2842_v22 = vpop.f32.mrf.mxu3  ;;  %v5353_v29 = vld [vmem:[#allocation5_spill] sm:$0xff] }
 0x442   :  { %v2499_v40 = vpop.f32.mrf.mxu0  ;;  %v2620_v63 = vpop.f32.mrf.mxu1  ;;  %v2120_v60 = vadd.f32 %v5353_v29, %v2022_v55 }
 0x443   :  { %2940 = vst.msk [vmem:[%s5108_s7 + $0x30] sm:$0xff] %vm2933_vm10, %v2919_v30  ;;  %v2621_v45 = vadd.f32 %v2620_v63, %v2495_v62  ;;  %v2744_v51 = vpop.f32.mrf.mxu2  ;;  %v2500_v58 = vadd.f32 %v2499_v40, %v4737_v43  ;;  %v5354_v63 = vld [vmem:[#allocation35_spill] sm:$0xff] }
 0x445   :  { %v2745_v35 = vadd.f32 %v2744_v51, %v2621_v45  ;;  %v2026_v45 = vadd.f32 %v5355_v11, %v5354_v63 }
 0x447   :  { %v2843_v31 = vadd.f32 %v2842_v22, %v2745_v35  ;;  %v3099_v22 = vld [vmem:[%s5104_s0 + $0x50] sm:$0xff] }
 0x448   :  { %v2903_v40 = vmul.f32 %v3099_v22, %v2120_v60  ;;  %v5364_v60 = vld [vmem:[#allocation38_spill] sm:$0xff] }
 0x449   :  { %v2920_v13 = vadd.f32 %v2900_v6, %v2843_v31  ;;  %v2846_v3 = vpop.f32.mrf.mxu3 }
 0x44a   :  { %v2504_v48 = vpop.f32.mrf.mxu0  ;;  %v2626_v1 = vpop.f32.mrf.mxu1 }
 0x44b   :  { %2941 = vst.msk [vmem:[%s5108_s7 + $0x38] sm:$0xff] %vm2933_vm10, %v2920_v13  ;;  %v2627_v28 = vadd.f32 %v2626_v1, %v2500_v58  ;;  %v2748_v20 = vpop.f32.mrf.mxu2  ;;  %v2505_v49 = vadd.f32 %v2504_v48, %v4749_v9  ;;  %v2124_v58 = vadd.f32 %v5356_v52, %v2026_v45  ;;  %v3100_v1 = vld [vmem:[%s5104_s0 + $0x58] sm:$0xff]  ;;  %v5367_v45 = vld [vmem:[#allocation22_spill] sm:$0xff] }
 0x44d   :  { %v2749_v12 = vadd.f32 %v2748_v20, %v2627_v28  ;;  %v2904_v18 = vmul.f32 %v3100_v1, %v2124_v58  ;;  %v5358_v28 = vld [vmem:[#allocation11_spill] sm:$0xff] }
 0x44e   :  { %v2030_v20 = vadd.f32 %v5358_v28, %v5357_v27 }
 0x44f   :  { %v2847_v43 = vadd.f32 %v2846_v3, %v2749_v12 }
 0x450   :  { %v2128_v46 = vadd.f32 %v5359_v19, %v2030_v20  ;;  %v5370_v20 = vld [vmem:[#allocation16_spill] sm:$0xff] }
 0x451   :  { %v2921_v47 = vadd.f32 %v2901_v53, %v2847_v43  ;;  %v2850_v41 = vpop.f32.mrf.mxu3 }
 0x452   :  { %v2509_v61 = vpop.f32.mrf.mxu0  ;;  %v2632_v10 = vpop.f32.mrf.mxu1 }
 0x453   :  { %2942 = vst.msk [vmem:[%s5108_s7 + $0x40] sm:$0xff] %vm2933_vm10, %v2921_v47  ;;  %v2633_v50 = vadd.f32 %v2632_v10, %v2505_v49  ;;  %v2752_v38 = vpop.f32.mrf.mxu2  ;;  %v2510_v59 = vadd.f32 %v2509_v61, %v4761_v21  ;;  %v3101_v61 = vld [vmem:[%s5104_s0 + $0x60] sm:$0xff] }
 0x454   :  { %v2905_v10 = vmul.f32 %v3101_v61, %v2128_v46 }
 0x455   :  { %v2753_v34 = vadd.f32 %v2752_v38, %v2633_v50  ;;  %v2034_v50 = vadd.f32 %v5361_v5, %v5360_v4  ;;  %v5362_v38 = vld [vmem:[#allocation41_spill] sm:$0xff]  ;;  %v3105_v5 = vld [vmem:[%s5104_s0 + $0x80] sm:$0xff] }
 0x457   :  { %v2851_v9 = vadd.f32 %v2850_v41, %v2753_v34  ;;  %v2132_v55 = vadd.f32 %v5363_v39, %v2034_v50  ;;  %v2909_v50 = vmul.f32 %v3105_v5, %v4829_v17  ;;  %v5371_v17 = vld [vmem:[#allocation23_spill] sm:$0xff] }
 0x459   :  { %v2922_v14 = vadd.f32 %v2902_v42, %v2851_v9  ;;  %v2854_v7 = vpop.f32.mrf.mxu3 }
 0x45a   :  { %v2514_v25 = vpop.f32.mrf.mxu0  ;;  %v2638_v15 = vpop.f32.mrf.mxu1 }
 0x45b   :  { %2943 = vst.msk [vmem:[%s5108_s7 + $0x48] sm:$0xff] %vm2933_vm10, %v2922_v14  ;;  %v2639_v57 = vadd.f32 %v2638_v15, %v2510_v59  ;;  %v2756_v62 = vpop.f32.mrf.mxu2  ;;  %v2515_v51 = vadd.f32 %v2514_v25, %v4773_v26  ;;  %v3102_v25 = vld [vmem:[%s5104_s0 + $0x68] sm:$0xff] }
 0x45c   :  { %v2906_v15 = vmul.f32 %v3102_v25, %v2132_v55 }
 0x45d   :  { %v2757_v30 = vadd.f32 %v2756_v62, %v2639_v57  ;;  %v5365_v57 = vld [vmem:[#allocation14_spill] sm:$0xff] }
 0x45e   :  { %v2038_v62 = vadd.f32 %v5365_v57, %v5364_v60 }
 0x45f   :  { %v2855_v21 = vadd.f32 %v2854_v7, %v2757_v30  ;;  %v5366_v30 = vld [vmem:[#allocation42_spill] sm:$0xff] }
 0x461   :  { %v2923_v35 = vadd.f32 %v2903_v40, %v2855_v21  ;;  %v2858_v44 = vpop.f32.mrf.mxu3 }
 0x462   :  { %v2519_v6 = vpop.f32.mrf.mxu0  ;;  %v2644_v31 = vpop.f32.mrf.mxu1 }
 0x463   :  { %2944 = vst.msk [vmem:[%s5108_s7 + $0x50] sm:$0xff] %vm2933_vm10, %v2923_v35  ;;  %v2645_v13 = vadd.f32 %v2644_v31, %v2515_v51  ;;  %v2760_v3 = vpop.f32.mrf.mxu2  ;;  %v2520_v12 = vadd.f32 %v2519_v6, %v4785_v23  ;;  %v2136_v51 = vadd.f32 %v5367_v45, %v2038_v62  ;;  %v3103_v31 = vld [vmem:[%s5104_s0 + $0x70] sm:$0xff] }
 0x465   :  { %v2761_v48 = vadd.f32 %v2760_v3, %v2645_v13  ;;  %v2907_v52 = vmul.f32 %v3103_v31, %v2136_v51  ;;  %v5368_v13 = vld [vmem:[#allocation39_spill] sm:$0xff] }
 0x466   :  { %v5369_v3 = vld [vmem:[#allocation15_spill] sm:$0xff] }
 0x467   :  { %v2859_v26 = vadd.f32 %v2858_v44, %v2761_v48  ;;  %v2042_v48 = vadd.f32 %v5369_v3, %v5368_v13 }
 0x469   :  { %v2924_v36 = vadd.f32 %v2904_v18, %v2859_v26  ;;  %v2862_v53 = vpop.f32.mrf.mxu3 }
 0x46a   :  { %v2524_v43 = vpop.f32.mrf.mxu0  ;;  %v2650_v37 = vpop.f32.mrf.mxu1 }
 0x46b   :  { %2945 = vst.msk [vmem:[%s5108_s7 + $0x58] sm:$0xff] %vm2933_vm10, %v2924_v36  ;;  %v2651_v49 = vadd.f32 %v2650_v37, %v2520_v12  ;;  %v2764_v47 = vpop.f32.mrf.mxu2  ;;  %v2525_v34 = vadd.f32 %v2524_v43, %v5362_v38  ;;  %v2140_v12 = vadd.f32 %v5370_v20, %v2042_v48  ;;  %v3104_v37 = vld [vmem:[%s5104_s0 + $0x78] sm:$0xff] }
 0x46d   :  { %v2765_v41 = vadd.f32 %v2764_v47, %v2651_v49  ;;  %v2908_v19 = vmul.f32 %v3104_v37, %v2140_v12 }
 0x46f   :  { %v2863_v23 = vadd.f32 %v2862_v53, %v2765_v41 }
 0x471   :  { %v2925_v2 = vadd.f32 %v2905_v10, %v2863_v23  ;;  %v2866_v42 = vpop.f32.mrf.mxu3 }
 0x472   :  { %v2529_v9 = vpop.f32.mrf.mxu0  ;;  %v2656_v0 = vpop.f32.mrf.mxu1 }
 0x473   :  { %2946 = vst.msk [vmem:[%s5108_s7 + $0x60] sm:$0xff] %vm2933_vm10, %v2925_v2  ;;  %v2657_v59 = vadd.f32 %v2656_v0, %v2525_v34  ;;  %v2768_v14 = vpop.f32.mrf.mxu2  ;;  %v2530_v22 = vadd.f32 %v2529_v9, %v5366_v30 }
 0x475   :  { %v2769_v7 = vadd.f32 %v2768_v14, %v2657_v59  ;;  %v3106_v59 = vld [vmem:[%s5104_s0 + $0x88] sm:$0xff] }
 0x476   :  { %v2910_v14 = vmul.f32 %v3106_v59, %v5371_v17 }
 0x477   :  { %v2867_v29 = vadd.f32 %v2866_v42, %v2769_v7 }
 0x479   :  { %v2926_v40 = vadd.f32 %v2906_v15, %v2867_v29  ;;  %v2870_v21 = vpop.f32.mrf.mxu3 }
 0x47a   :  { %v2534_v63 = vpop.f32.mrf.mxu0  ;;  %v2662_v11 = vpop.f32.mrf.mxu1 }
 0x47b   :  { %2947 = vst.msk [vmem:[%s5108_s7 + $0x68] sm:$0xff] %vm2933_vm10, %v2926_v40  ;;  %v2663_v35 = vadd.f32 %v2662_v11, %v2530_v22  ;;  %v2772_v44 = vpop.f32.mrf.mxu2  ;;  %v2535_v1 = vadd.f32 %v2534_v63, %v4820_v8  ;;  %v3107_v22 = vld [vmem:[%s5104_s0 + $0x90] sm:$0xff] }
 0x47c   :  { %v2911_v40 = vmul.f32 %v3107_v22, %v4851_v32 }
 0x47d   :  { %v2773_v6 = vadd.f32 %v2772_v44, %v2663_v35 }
 0x47f   :  { %v2871_v58 = vadd.f32 %v2870_v21, %v2773_v6  ;;  %v3108_v6 = vld [vmem:[%s5104_s0 + $0x98] sm:$0xf] }
 0x480   :  { %v2912_v32 = vmul.f32 %v3108_v6, %v4861_v24 }
 0x481   :  { %v2927_v18 = vadd.f32 %v2907_v52, %v2871_v58  ;;  %v2874_v26 = vpop.f32.mrf.mxu3 }
 0x482   :  { %v2539_v27 = vpop.f32.mrf.mxu0  ;;  %v2668_v28 = vpop.f32.mrf.mxu1 }
 0x483   :  { %2948 = vst.msk [vmem:[%s5108_s7 + $0x70] sm:$0xff] %vm2933_vm10, %v2927_v18  ;;  %v2669_v36 = vadd.f32 %v2668_v28, %v2535_v1  ;;  %v2776_v53 = vpop.f32.mrf.mxu2  ;;  %v2540_v46 = vadd.f32 %v2539_v27, %v4831_v56 }
 0x485   :  { %v2777_v43 = vadd.f32 %v2776_v53, %v2669_v36 }
 0x487   :  { %v2875_v8 = vadd.f32 %v2874_v26, %v2777_v43 }
 0x489   :  { %v2928_v49 = vadd.f32 %v2908_v19, %v2875_v8  ;;  %v2878_v47 = vpop.f32.mrf.mxu3 }
 0x48a   :  { %v2544_v41 = vpop.f32.mrf.mxu0  ;;  %v2674_v61 = vpop.f32.mrf.mxu1 }
 0x48b   :  { %2949 = vst.msk [vmem:[%s5108_s7 + $0x78] sm:$0xff] %vm2933_vm10, %v2928_v49  ;;  %v2675_v10 = vadd.f32 %v2674_v61, %v2540_v46  ;;  %v2780_v23 = vpop.f32.mrf.mxu2  ;;  %v2545_v56 = vadd.f32 %v2544_v41, %v4842_v54 }
 0x48d   :  { %v2781_v4 = vadd.f32 %v2780_v23, %v2675_v10 }
 0x48f   :  { %v2879_v38 = vadd.f32 %v2878_v47, %v2781_v4 }
 0x491   :  { %v2929_v34 = vadd.f32 %v2909_v50, %v2879_v38  ;;  %v2882_v2 = vpop.f32.mrf.mxu3 }
 0x492   :  { %v2680_v42 = vpop.f32.mrf.mxu1  ;;  %v2549_v39 = vpop.f32.mrf.mxu0 }
 0x493   :  { %2950 = vst.msk [vmem:[%s5108_s7 + $0x80] sm:$0xff] %vm2933_vm10, %v2929_v34  ;;  %v2681_v9 = vadd.f32 %v2680_v42, %v2545_v56  ;;  %v2784_v0 = vpop.f32.mrf.mxu2  ;;  %v2550_v54 = vadd.f32 %v2549_v39, %v4853_v33 }
 0x495   :  { %v2785_v55 = vadd.f32 %v2784_v0, %v2681_v9 }
 0x497   :  { %v2883_v7 = vadd.f32 %v2882_v2, %v2785_v55 }
 0x499   :  { %v2930_v25 = vadd.f32 %v2910_v14, %v2883_v7  ;;  %v2886_v57 = vpop.f32.mrf.mxu3 }
 0x49a   :  { %v2686_v15 = vpop.f32.mrf.mxu1  ;;  %v2554_v30 = vpop.f32.mrf.mxu0 }
 0x49b   :  { %2951 = vst.msk [vmem:[%s5108_s7 + $0x88] sm:$0xff] %vm2933_vm10, %v2930_v25  ;;  %v2687_v29 = vadd.f32 %v2686_v15, %v2550_v54  ;;  %v2788_v60 = vpop.f32.mrf.mxu2  ;;  %v2555_v33 = vadd.f32 %v2554_v30, %v4863_v16 }
 0x49d   :  { %v2789_v62 = vadd.f32 %v2788_v60, %v2687_v29 }
 0x49f   :  { %v2887_v21 = vadd.f32 %v2886_v57, %v2789_v62 }
 0x4a1   :  { %v2931_v63 = vadd.f32 %v2911_v40, %v2887_v21  ;;  %v2890_v44 = vpop.f32.mrf.mxu3 }
 0x4a2   :  { %v2692_v11 = vpop.f32.mrf.mxu1 }
 0x4a3   :  { %2952 = vst.msk [vmem:[%s5108_s7 + $0x90] sm:$0xff] %vm2933_vm10, %v2931_v63  ;;  %v2693_v45 = vadd.f32 %v2692_v11, %v2555_v33  ;;  %v2792_v51 = vpop.f32.mrf.mxu2 }
 0x4a5   :  { %v2793_v35 = vadd.f32 %v2792_v51, %v2693_v45 }
 0x4a7   :  { %v2891_v31 = vadd.f32 %v2890_v44, %v2793_v35 }
 0x4a9   :  { %v2932_v16 = vadd.f32 %v2912_v32, %v2891_v31 }
 0x4ab   :  { %2954 = vst.msk [vmem:[%s5108_s7 + $0x98] sm:$0xf] %vm2953_vm11, %v2932_v16 }

</bundles_post_ra>
